<compile_context>
chip_gen: v7x
topology: tpu7x:2x2x1
jax: 0.10.0
libtpu: 0.0.40
codegen_flags: <defaults>
</compile_context>

<pallas_src>
import functools
import math

import jax
import jax.numpy as jnp
from jax.experimental import pallas as pl
from jax.experimental.pallas import tpu as pltpu

LAYER_DIMS = [(32, 128), (128, 256), (256, 256), (256, 128), (128, 128)]
IN_DIM = 32
OUT_DIM = 128


def _round_up(x, m):
    return ((x + m - 1) // m) * m


def _choose_block_b(B, *, target=512, min_block=128):
    """Pick the batch tile.

    Big enough to amortize the ~0.35 us/step grid overhead (512 for large B),
    but for small/medium batches split into >=2 roughly equal tiles so the
    "parallel" grid axis can be sharded across both v7x TensorCores.
    """
    if B <= min_block:
        return _round_up(B, 8)
    if B <= 2 * target:
        return max(min_block, _round_up(pl.cdiv(B, 2), 8))
    return target


def _supports_bf16_epilogue():
    """bf16 VALU/EUP exist on v6e and v7x; keep f32 elementwise on v5e/v4."""
    try:
        kind = jax.devices()[0].device_kind.lower()
    except Exception:
        return False
    return ("v6" in kind) or ("v7" in kind)


def _dqn_kernel(x_ref,
                w1_ref, b1_ref,
                w2_ref, b2_ref,
                w3_ref, b3_ref,
                w4_ref, b4_ref,
                w5_ref, b5_ref,
                o_ref, *, epi_dtype):
    def dense(h, w_ref, b_ref):
        # bf16 MXU operands, f32 accumulation, bias add in the epilogue dtype.
        y = jnp.dot(h, w_ref[...], preferred_element_type=jnp.float32)
        return y.astype(epi_dtype) + b_ref[...]

    # Raw 32-wide input tile; cast to bf16 once (no wrapper-side pad/copy).
    h = x_ref[...].astype(jnp.bfloat16)                       # (blk, 32)
    h = jnp.maximum(dense(h, w1_ref, b1_ref), 0).astype(jnp.bfloat16)
    h = jnp.maximum(dense(h, w2_ref, b2_ref), 0).astype(jnp.bfloat16)
    h = jnp.maximum(dense(h, w3_ref, b3_ref), 0).astype(jnp.bfloat16)
    h = jnp.maximum(dense(h, w4_ref, b4_ref), 0).astype(jnp.bfloat16)
    o_ref[...] = jnp.tanh(dense(h, w5_ref, b5_ref)).astype(o_ref.dtype)


def dqn_forward(x, params, *, block_b=None, epilogue_dtype=jnp.float32):
    """x: (B, 32) float32.
    params: list of 5 (W, b); W[i] is bf16 (in, out); b[i] is (1, out) in the
    epilogue dtype (f32 on v5e/v4, bf16 on v6e/v7x)."""
    B, f_in = x.shape
    assert f_in == IN_DIM, f"expected {IN_DIM} input features, got {f_in}"

    if block_b is None:
        block_b = _choose_block_b(B)
    block_b = max(8, _round_up(min(block_b, _round_up(B, 8)), 8))
    padded_b = _round_up(B, block_b)
    if padded_b != B:                       # only for ragged batches
        x = jnp.pad(x, ((0, padded_b - B), (0, 0)))
    grid = (padded_b // block_b,)

    flat_args = [x]
    for w, b in params:
        flat_args.append(w)
        flat_args.append(b)

    const_map = lambda i: (0, 0)            # weights/biases resident in VMEM
    in_specs = [pl.BlockSpec((block_b, IN_DIM), lambda i: (i, 0))]
    for w, b in params:
        in_specs.append(pl.BlockSpec(w.shape, const_map))
        in_specs.append(pl.BlockSpec(b.shape, const_map))

    per_row_flops = 2 * sum(ci * co for ci, co in LAYER_DIMS)
    weight_bytes = sum(w.size * w.dtype.itemsize + b.size * b.dtype.itemsize
                       for w, b in params)
    cost = pl.CostEstimate(
        flops=per_row_flops * padded_b,
        transcendentals=OUT_DIM * padded_b,
        bytes_accessed=(weight_bytes
                        + padded_b * IN_DIM * x.dtype.itemsize
                        + padded_b * OUT_DIM * 4),
    )

    kernel = functools.partial(_dqn_kernel, epi_dtype=epilogue_dtype)

    out = pl.pallas_call(
        kernel,
        out_shape=jax.ShapeDtypeStruct((padded_b, OUT_DIM), jnp.float32),
        grid=grid,
        in_specs=in_specs,
        out_specs=pl.BlockSpec((block_b, OUT_DIM), lambda i: (i, 0)),
        compiler_params=pltpu.CompilerParams(
            dimension_semantics=("parallel",)),
        cost_estimate=cost,
    )(*flat_args)

    return out if padded_b == B else out[:B]


def init_dqn_params(key, *, bias_dtype=jnp.float32):
    """PyTorch nn.Linear default init: U(-1/sqrt(fan_in), 1/sqrt(fan_in)).
    Weights stored pre-transposed (in, out) in bf16; biases in bias_dtype."""
    params = []
    for fan_in, fan_out in LAYER_DIMS:
        key, kw, kb = jax.random.split(key, 3)
        bound = 1.0 / math.sqrt(float(fan_in))
        w = jax.random.uniform(kw, (fan_in, fan_out), jnp.float32, -bound, bound)
        b = jax.random.uniform(kb, (1, fan_out), jnp.float32, -bound, bound)
        params.append((w.astype(jnp.bfloat16), b.astype(bias_dtype)))
    return params


def dqn_reference(x, params, epi_dtype):
    """Pure-JAX reference mirroring the kernel's bf16-operand / f32-accum
    matmuls and its epilogue dtype."""
    h = x.astype(jnp.bfloat16)
    for i, (w, b) in enumerate(params):
        y = jnp.dot(h, w, preferred_element_type=jnp.float32).astype(epi_dtype) + b
        if i < len(params) - 1:
            h = jnp.maximum(y, 0).astype(jnp.bfloat16)
        else:
            h = jnp.tanh(y).astype(jnp.float32)
    return h


if __name__ == "__main__":
    key = jax.random.PRNGKey(0)
    key, kx = jax.random.split(key)

    B = 256                                  # -> block_b=128, grid of 2 tiles
    x = jax.random.normal(kx, (B, IN_DIM), jnp.float32)

    epi_dtype = jnp.bfloat16 if _supports_bf16_epilogue() else jnp.float32
    params = init_dqn_params(key, bias_dtype=epi_dtype)

    out = dqn_forward(x, params, epilogue_dtype=epi_dtype)
    out = jax.block_until_ready(out)

    ref = dqn_reference(x, params, epi_dtype)
    assert out.shape == (B, OUT_DIM)
    assert jnp.allclose(out, ref, atol=2e-2, rtol=2e-2), "mismatch vs reference"

    print("KERNEL_OK")
</pallas_src>

<mosaic_0001>
module attributes {stable_mosaic.version = 11 : i64} {
  func.func @_dqn_kernel(%arg0: i32, %arg1: memref<128x32xf32, #tpu.memory_space<vmem>>, %arg2: memref<32x128xbf16, #tpu.memory_space<vmem>>, %arg3: memref<1x128xf32, #tpu.memory_space<vmem>>, %arg4: memref<128x256xbf16, #tpu.memory_space<vmem>>, %arg5: memref<1x256xf32, #tpu.memory_space<vmem>>, %arg6: memref<256x256xbf16, #tpu.memory_space<vmem>>, %arg7: memref<1x256xf32, #tpu.memory_space<vmem>>, %arg8: memref<256x128xbf16, #tpu.memory_space<vmem>>, %arg9: memref<1x128xf32, #tpu.memory_space<vmem>>, %arg10: memref<128x128xbf16, #tpu.memory_space<vmem>>, %arg11: memref<1x128xf32, #tpu.memory_space<vmem>>, %arg12: memref<128x128xf32, #tpu.memory_space<vmem>>) attributes {dimension_semantics = [#tpu.dimension_semantics<parallel>], iteration_bounds = array<i64: 2>, scalar_prefetch = 0 : i64, scratch_operands = 0 : i64, tpu.core_type = #tpu.core_type<tc>, window_params = [{transform_indices = @transform_0, window_bounds = array<i64: 128, 32>}, {pipeline_mode = #tpu.pipeline_mode<synchronous>, transform_indices = @transform_1, window_bounds = array<i64: 32, 128>}, {pipeline_mode = #tpu.pipeline_mode<synchronous>, transform_indices = @transform_2, window_bounds = array<i64: 1, 128>}, {pipeline_mode = #tpu.pipeline_mode<synchronous>, transform_indices = @transform_3, window_bounds = array<i64: 128, 256>}, {pipeline_mode = #tpu.pipeline_mode<synchronous>, transform_indices = @transform_4, window_bounds = array<i64: 1, 256>}, {pipeline_mode = #tpu.pipeline_mode<synchronous>, transform_indices = @transform_5, window_bounds = array<i64: 256, 256>}, {pipeline_mode = #tpu.pipeline_mode<synchronous>, transform_indices = @transform_6, window_bounds = array<i64: 1, 256>}, {pipeline_mode = #tpu.pipeline_mode<synchronous>, transform_indices = @transform_7, window_bounds = array<i64: 256, 128>}, {pipeline_mode = #tpu.pipeline_mode<synchronous>, transform_indices = @transform_8, window_bounds = array<i64: 1, 128>}, {pipeline_mode = #tpu.pipeline_mode<synchronous>, transform_indices = @transform_9, window_bounds = array<i64: 128, 128>}, {pipeline_mode = #tpu.pipeline_mode<synchronous>, transform_indices = @transform_10, window_bounds = array<i64: 1, 128>}, {transform_indices = @transform_11, window_bounds = array<i64: 128, 128>}]} {
    %c0 = arith.constant 0 : index
    %c0_0 = arith.constant 0 : index
    %0 = vector.load %arg1[%c0, %c0_0] : memref<128x32xf32, #tpu.memory_space<vmem>>, vector<128x32xf32>
    %1 = arith.truncf %0 : vector<128x32xf32> to vector<128x32xbf16>
    %c0_1 = arith.constant 0 : index
    %c0_2 = arith.constant 0 : index
    %2 = vector.load %arg2[%c0_1, %c0_2] : memref<32x128xbf16, #tpu.memory_space<vmem>>, vector<32x128xbf16>
    %cst = arith.constant dense<0.000000e+00> : vector<128x128xf32>
    %3 = tpu.matmul %1, %2, %cst {dimension_numbers = #tpu.dot_dimension_numbers<[1], [0], [0], [1], [0, 0, 1, 1], [], []>} : vector<128x32xbf16>, vector<32x128xbf16>, vector<128x128xf32> -> vector<128x128xf32>
    %c0_3 = arith.constant 0 : index
    %c0_4 = arith.constant 0 : index
    %4 = vector.load %arg3[%c0_3, %c0_4] : memref<1x128xf32, #tpu.memory_space<vmem>>, vector<1x128xf32>
    %5 = vector.broadcast %4 : vector<1x128xf32> to vector<128x128xf32>
    %6 = arith.addf %3, %5 : vector<128x128xf32>
    %cst_5 = arith.constant 0.000000e+00 : f32
    %7 = vector.broadcast %cst_5 : f32 to vector<128x128xf32>
    %8 = arith.maximumf %6, %7 : vector<128x128xf32>
    %9 = arith.truncf %8 : vector<128x128xf32> to vector<128x128xbf16>
    %c0_6 = arith.constant 0 : index
    %c0_7 = arith.constant 0 : index
    %10 = vector.load %arg4[%c0_6, %c0_7] : memref<128x256xbf16, #tpu.memory_space<vmem>>, vector<128x256xbf16>
    %cst_8 = arith.constant dense<0.000000e+00> : vector<128x256xf32>
    %11 = tpu.matmul %9, %10, %cst_8 {dimension_numbers = #tpu.dot_dimension_numbers<[1], [0], [0], [1], [0, 0, 1, 1], [], []>} : vector<128x128xbf16>, vector<128x256xbf16>, vector<128x256xf32> -> vector<128x256xf32>
    %c0_9 = arith.constant 0 : index
    %c0_10 = arith.constant 0 : index
    %12 = vector.load %arg5[%c0_9, %c0_10] : memref<1x256xf32, #tpu.memory_space<vmem>>, vector<1x256xf32>
    %13 = vector.broadcast %12 : vector<1x256xf32> to vector<128x256xf32>
    %14 = arith.addf %11, %13 : vector<128x256xf32>
    %cst_11 = arith.constant 0.000000e+00 : f32
    %15 = vector.broadcast %cst_11 : f32 to vector<128x256xf32>
    %16 = arith.maximumf %14, %15 : vector<128x256xf32>
    %17 = arith.truncf %16 : vector<128x256xf32> to vector<128x256xbf16>
    %c0_12 = arith.constant 0 : index
    %c0_13 = arith.constant 0 : index
    %18 = vector.load %arg6[%c0_12, %c0_13] : memref<256x256xbf16, #tpu.memory_space<vmem>>, vector<256x256xbf16>
    %cst_14 = arith.constant dense<0.000000e+00> : vector<128x256xf32>
    %19 = tpu.matmul %17, %18, %cst_14 {dimension_numbers = #tpu.dot_dimension_numbers<[1], [0], [0], [1], [0, 0, 1, 1], [], []>} : vector<128x256xbf16>, vector<256x256xbf16>, vector<128x256xf32> -> vector<128x256xf32>
    %c0_15 = arith.constant 0 : index
    %c0_16 = arith.constant 0 : index
    %20 = vector.load %arg7[%c0_15, %c0_16] : memref<1x256xf32, #tpu.memory_space<vmem>>, vector<1x256xf32>
    %21 = vector.broadcast %20 : vector<1x256xf32> to vector<128x256xf32>
    %22 = arith.addf %19, %21 : vector<128x256xf32>
    %cst_17 = arith.constant 0.000000e+00 : f32
    %23 = vector.broadcast %cst_17 : f32 to vector<128x256xf32>
    %24 = arith.maximumf %22, %23 : vector<128x256xf32>
    %25 = arith.truncf %24 : vector<128x256xf32> to vector<128x256xbf16>
    %c0_18 = arith.constant 0 : index
    %c0_19 = arith.constant 0 : index
    %26 = vector.load %arg8[%c0_18, %c0_19] : memref<256x128xbf16, #tpu.memory_space<vmem>>, vector<256x128xbf16>
    %cst_20 = arith.constant dense<0.000000e+00> : vector<128x128xf32>
    %27 = tpu.matmul %25, %26, %cst_20 {dimension_numbers = #tpu.dot_dimension_numbers<[1], [0], [0], [1], [0, 0, 1, 1], [], []>} : vector<128x256xbf16>, vector<256x128xbf16>, vector<128x128xf32> -> vector<128x128xf32>
    %c0_21 = arith.constant 0 : index
    %c0_22 = arith.constant 0 : index
    %28 = vector.load %arg9[%c0_21, %c0_22] : memref<1x128xf32, #tpu.memory_space<vmem>>, vector<1x128xf32>
    %29 = vector.broadcast %28 : vector<1x128xf32> to vector<128x128xf32>
    %30 = arith.addf %27, %29 : vector<128x128xf32>
    %cst_23 = arith.constant 0.000000e+00 : f32
    %31 = vector.broadcast %cst_23 : f32 to vector<128x128xf32>
    %32 = arith.maximumf %30, %31 : vector<128x128xf32>
    %33 = arith.truncf %32 : vector<128x128xf32> to vector<128x128xbf16>
    %c0_24 = arith.constant 0 : index
    %c0_25 = arith.constant 0 : index
    %34 = vector.load %arg10[%c0_24, %c0_25] : memref<128x128xbf16, #tpu.memory_space<vmem>>, vector<128x128xbf16>
    %cst_26 = arith.constant dense<0.000000e+00> : vector<128x128xf32>
    %35 = tpu.matmul %33, %34, %cst_26 {dimension_numbers = #tpu.dot_dimension_numbers<[1], [0], [0], [1], [0, 0, 1, 1], [], []>} : vector<128x128xbf16>, vector<128x128xbf16>, vector<128x128xf32> -> vector<128x128xf32>
    %c0_27 = arith.constant 0 : index
    %c0_28 = arith.constant 0 : index
    %36 = vector.load %arg11[%c0_27, %c0_28] : memref<1x128xf32, #tpu.memory_space<vmem>>, vector<1x128xf32>
    %37 = vector.broadcast %36 : vector<1x128xf32> to vector<128x128xf32>
    %38 = arith.addf %35, %37 : vector<128x128xf32>
    %39 = math.tanh %38 : vector<128x128xf32>
    %c0_29 = arith.constant 0 : index
    %c0_30 = arith.constant 0 : index
    %40 = vector.load %arg12[%c0_29, %c0_30] : memref<128x128xf32, #tpu.memory_space<vmem>>, vector<128x128xf32>
    tpu.vector_store %arg12[%c0_29, %c0_30], %39 {strides = array<i32>} : memref<128x128xf32, #tpu.memory_space<vmem>>, vector<128x128xf32>,
    return
  }
  func.func @transform_0(%arg0: i32) -> (i32, i32) {
    %c0_i32 = arith.constant 0 : i32
    %c0_i32_0 = arith.constant 0 : i32
    return %arg0, %c0_i32 : i32, i32
  }
  func.func @transform_1(%arg0: i32) -> (i32, i32) {
    %c0_i32 = arith.constant 0 : i32
    %c0_i32_0 = arith.constant 0 : i32
    %c0_i32_1 = arith.constant 0 : i32
    return %c0_i32, %c0_i32_0 : i32, i32
  }
  func.func @transform_2(%arg0: i32) -> (i32, i32) {
    %c0_i32 = arith.constant 0 : i32
    %c0_i32_0 = arith.constant 0 : i32
    %c0_i32_1 = arith.constant 0 : i32
    return %c0_i32, %c0_i32_0 : i32, i32
  }
  func.func @transform_3(%arg0: i32) -> (i32, i32) {
    %c0_i32 = arith.constant 0 : i32
    %c0_i32_0 = arith.constant 0 : i32
    %c0_i32_1 = arith.constant 0 : i32
    return %c0_i32, %c0_i32_0 : i32, i32
  }
  func.func @transform_4(%arg0: i32) -> (i32, i32) {
    %c0_i32 = arith.constant 0 : i32
    %c0_i32_0 = arith.constant 0 : i32
    %c0_i32_1 = arith.constant 0 : i32
    return %c0_i32, %c0_i32_0 : i32, i32
  }
  func.func @transform_5(%arg0: i32) -> (i32, i32) {
    %c0_i32 = arith.constant 0 : i32
    %c0_i32_0 = arith.constant 0 : i32
    %c0_i32_1 = arith.constant 0 : i32
    return %c0_i32, %c0_i32_0 : i32, i32
  }
  func.func @transform_6(%arg0: i32) -> (i32, i32) {
    %c0_i32 = arith.constant 0 : i32
    %c0_i32_0 = arith.constant 0 : i32
    %c0_i32_1 = arith.constant 0 : i32
    return %c0_i32, %c0_i32_0 : i32, i32
  }
  func.func @transform_7(%arg0: i32) -> (i32, i32) {
    %c0_i32 = arith.constant 0 : i32
    %c0_i32_0 = arith.constant 0 : i32
    %c0_i32_1 = arith.constant 0 : i32
    return %c0_i32, %c0_i32_0 : i32, i32
  }
  func.func @transform_8(%arg0: i32) -> (i32, i32) {
    %c0_i32 = arith.constant 0 : i32
    %c0_i32_0 = arith.constant 0 : i32
    %c0_i32_1 = arith.constant 0 : i32
    return %c0_i32, %c0_i32_0 : i32, i32
  }
  func.func @transform_9(%arg0: i32) -> (i32, i32) {
    %c0_i32 = arith.constant 0 : i32
    %c0_i32_0 = arith.constant 0 : i32
    %c0_i32_1 = arith.constant 0 : i32
    return %c0_i32, %c0_i32_0 : i32, i32
  }
  func.func @transform_10(%arg0: i32) -> (i32, i32) {
    %c0_i32 = arith.constant 0 : i32
    %c0_i32_0 = arith.constant 0 : i32
    %c0_i32_1 = arith.constant 0 : i32
    return %c0_i32, %c0_i32_0 : i32, i32
  }
  func.func @transform_11(%arg0: i32) -> (i32, i32) {
    %c0_i32 = arith.constant 0 : i32
    %c0_i32_0 = arith.constant 0 : i32
    return %arg0, %c0_i32 : i32, i32
  }
}

</mosaic_0001>

<bundles_post_ra>
// kernel: tpu_custom_call.1
= control target key start
LH: loop header
LB: loop body
LE: loop exit
PB: predicated region body
PF: predicated region fallthrough
CT: control target
= control target key end

     0   :  { %s3019_s0 = inlined_call_operand.vmem [shape: f32[256,32], index: 0, kind: input, shape index: {}]   ;;  %s3020_s1 = inlined_call_operand.vmem [shape: bf16[32,128], index: 1, kind: input, shape index: {}]   ;;  %s3021_s2 = inlined_call_operand.hbm [shape: f32[1,128], index: 2, kind: input, shape index: {}]   ;;  %s3022_s3 = inlined_call_operand.hbm [shape: bf16[128,256], index: 3, kind: input, shape index: {}]   ;;  %s3023_s4 = inlined_call_operand.vmem [shape: f32[1,256], index: 4, kind: input, shape index: {}]   ;;  %s3024_s5 = inlined_call_operand.vmem [shape: bf16[256,256], index: 5, kind: input, shape index: {}]   ;;  %s3025_s6 = inlined_call_operand.vmem [shape: f32[1,256], index: 6, kind: input, shape index: {}]   ;;  %s3026_s7 = inlined_call_operand.hbm [shape: bf16[256,128], index: 7, kind: input, shape index: {}]   ;;  %s3027_s8 = inlined_call_operand.vmem [shape: f32[1,128], index: 8, kind: input, shape index: {}]   ;;  %s3028_s9 = inlined_call_operand.vmem [shape: bf16[128,128], index: 9, kind: input, shape index: {}]   ;;  %s3029_s10 = inlined_call_operand.vmem [shape: f32[1,128], index: 10, kind: input, shape index: {}]   ;;  %s3030_s11 = inlined_call_operand.hbm [shape: f32[256,128], index: 11, kind: output, shape index: {}]  }
   0x1   :  { %3041 = sst [smem:[#allocation18_spill]] %s3030_s11 }
   0x2   :  { %16 = vsyncpa [#allocation3], 0 }
   0x3   :  { %17 = vsyncpa [#allocation6], 0 }
   0x4   :  { %18 = vsyncpa [#allocation4], 0 }
   0x5   :  { %20 = vsyncpa [#allocation4 + $0x1], 0  ;;  %s2501_s17 = smov 0   ;;  %s2503_s18 = smov 0  }
   0x6   :  { %s2505_s19 = smov 0   ;;  %s2507_s20 = smov 0  }
   0x7 LB: > { %3042 = sst [smem:[#allocation12_spill]] %s2416_s17  ;;  %s2522_s21 = sadd.s32 4294967295, %s2428_s20   ;;  %s2428_s20 = sphi %s2507_s20, %s3064_s20   ;;  %s2424_s19 = sphi %s2505_s19, %s3066_s19   ;;  %s2420_s18 = sphi %s2503_s18, %s3068_s18   ;;  %s2416_s17 = sphi %s2501_s17, %s3067_s17  }
   0x8   : > { %3043 = sst [smem:[#allocation13_spill]] %s2424_s19  ;;  %s1821_s22 = sadd.s32 4294967294, %s2428_s20  }
   0x9   : > { %3044 = sst [smem:[#allocation14_spill]] %s2428_s20  ;;  %s2526_s23 = sadd.s32 1, %s2428_s20  }
   0xa   : > { %3045 = sst [smem:[#allocation15_spill]] %s2526_s23  ;;  %s269_s24 = sadd.s32 1, %s2424_s19 }
   0xb   : > { %s266_s25 = ssub.s32 %s2428_s20, %s2526_s23  ;;  %p279_p0 = scmp.ne.s32.totalorder %s2424_s19, %s2420_s18 }
   0xc   : > { %p267_p1 = scmp.eq.s32.totalorder %s266_s25, 0  ;;  %p280_p2 = scmp.eq.s32.totalorder %s2522_s21, 1 }
   0xd   : > { %p285_p3 = scmp.ne.s32.totalorder %s2420_s18, %s2416_s17  ;;  %p286_p4 = scmp.eq.s32.totalorder %s1821_s22, 1 }
   0xe   : > { %s2537_s26 = scalar_select %p267_p1, %s2424_s19, %s269_s24  }
   0xf   : > { %p2539_p5 = por %p280_p2, %p279_p0  ;;  %p2543_p6 = por %p286_p4, %p285_p3 }
  0x10   : > { %3046 = sst [smem:[#allocation16_spill]] %s2537_s26  ;;  %p1822_p7 = scmp.ge.s32.totalorder %s2428_s20, 1 }
  0x11   : > { %s3047_s27 = scalar_select %p2539_p5, 1, 0 }
  0x12   : > { %s3048_s28 = scalar_select %p2543_p6, 1, 0 }
  0x13   : > { %p293_p8 = scmp.lt.s32.totalorder %s2428_s20, 3  ;;  %p3034_p9 = scmp.eq.s32.totalorder %s2522_s21, 0 }
  0x14   : > { %3049 = sst [smem:[#allocation17_spill]] %s3048_s28  ;;  %s2430_s30 = smov [#allocation5]  }
  0x15   : > { %p2550_p10 = pnand %p1822_p7, %p293_p8  ;;  %s319_s12 = sshll.u32 %s2430_s30, 4  ;;  %s2556_s12 = int_to_ptr.vmem [resolvable:$true] %s319_s12 }
  0x16   : > { %s2431_s14 = smov [#allocation2]   ;;  %s2432_s16 = smov [#allocation7]  }
  0x17   : > { %s3050_s29 = scalar_select %p2550_p10, 1, 0 }
  0x18   : > { %p2081_p11 = pneg %p2550_p10  ;;  %s309_s15 = sshll.u32 %s2431_s14, 4  ;;  %s2564_s15 = int_to_ptr.vmem [resolvable:$true] %s309_s15 }
  0x19   : > { %s2566_s22 = sshll.u32 %s2432_s16, 4  ;;  %s2274_s30 = scalar_lea.hbm %s3022_s3, 2048  ;;  %s342_s22 = int_to_ptr.vmem [resolvable:$true] %s2566_s22 }
  0x1a   : > { %p2560_p12 = pnand %p3034_p9, %p2081_p11  ;;  %p2275_p13 = scmp.ne.s32.totalorder %s3022_s3, %s2274_s30 }
  0x1b   : > { %p2281_p3 = scmp.lt.u32.totalorder %s2274_s30, %s3022_s3 }
  0x1c   : > { %p2576_p0 = pneg %p2560_p12 }
  0x1e   : > { %p2277_p1 = pnand %p2576_p0, %p2275_p13 }
  0x20   : > { %p2278_p2 = pneg %p2277_p1 }
  0x22   : > { %p2283_p4 = pnand %p2281_p3, %p2278_p2 }
  0x24   : > { %2286 = shalt.err (!%p2283_p4)
}
  0x25   : > { %s2287_s19 = scalar_lea.vmem %s2556_s12, 2048  ;;  %p2295_p9 = scmp.lt.s32.totalorder %s2556_s12, %s2556_s12 }
  0x26   : > { %p2288_p7 = scmp.ne.s32.totalorder %s2556_s12, %s2287_s19  ;;  %p2296_p6 = scmp.lt.s32.totalorder %s2287_s19, %s2287_s19 }
  0x28   : > { %p2290_p8 = pnand %p2288_p7, %p2576_p0  ;;  %p2297_p13 = por %p2296_p6, %p2295_p9 }
  0x2a   : > { %p2291_p11 = pneg %p2290_p8 }
  0x2c   : > { %p2298_p1 = pnand %p2297_p13, %p2291_p11 }
  0x2e   : > { %2301 = shalt.err (!%p2298_p1)
}
  0x2f   : > { %s2433_s26 = smov 128   ;;  %s2434_s24 = smov 8  }
  0x30   : > { %2087 = dma.hbm_to_vmem [thread:$0]  (!%p2560_p12), %s3022_s3, 2048, %s2556_s12, [#allocation6], %s2433_s26, %s2433_s26, %s2434_s24  }
  0x31   : > { %s2302_s28 = scalar_lea.hbm %s3021_s2, 16 }
  0x32   : > { %p2303_p6 = scmp.ne.s32.totalorder %s3021_s2, %s2302_s28  ;;  %p2309_p3 = scmp.lt.u32.totalorder %s2302_s28, %s3021_s2 }
  0x34   : > { %p2305_p9 = pnand %p2303_p6, %p2576_p0 }
  0x36   : > { %p2306_p2 = pneg %p2305_p9 }
  0x38   : > { %p2311_p4 = pnand %p2309_p3, %p2306_p2 }
  0x3a   : > { %2314 = shalt.err (!%p2311_p4)
}
  0x3b   : > { %s2315_s12 = scalar_lea.vmem %s2564_s15, 16  ;;  %s2322_s17 = scalar_lea.vmem %s2564_s15, 32 }
  0x3c   : > { %p2316_p7 = scmp.ne.s32.totalorder %s2564_s15, %s2315_s12  ;;  %p2323_p13 = scmp.lt.s32.totalorder %s2564_s15, %s2564_s15 }
  0x3d   : > { %p2324_p1 = scmp.lt.s32.totalorder %s2322_s17, %s2315_s12 }
  0x3e   : > { %p2318_p8 = pnand %p2316_p7, %p2576_p0 }
  0x3f   : > { %p2325_p6 = por %p2324_p1, %p2323_p13 }
  0x40   : > { %p2319_p11 = pneg %p2318_p8 }
  0x42   : > { %p2326_p9 = pnand %p2325_p6, %p2319_p11 }
  0x44   : > { %2329 = shalt.err (!%p2326_p9)
}
  0x45   : > { %2084 = dma.hbm_to_vmem [thread:$0]  (!%p2560_p12), %s3021_s2, 16, %s2564_s15, [#allocation3]  }
  0x46   : > { %s2330_s24 = scalar_lea.hbm %s3026_s7, 2048 }
  0x47   : > { %p2331_p2 = scmp.ne.s32.totalorder %s3026_s7, %s2330_s24  ;;  %p2337_p7 = scmp.lt.u32.totalorder %s2330_s24, %s3026_s7 }
  0x49   : > { %p2333_p3 = pnand %p2331_p2, %p2576_p0 }
  0x4b   : > { %p2334_p4 = pneg %p2333_p3 }
  0x4d   : > { %p2339_p8 = pnand %p2337_p7, %p2334_p4 }
  0x4f   : > { %2342 = shalt.err (!%p2339_p8)
}
  0x50   : > { %s2343_s19 = scalar_lea.vmem %s342_s22, 2048  ;;  %p2351_p6 = scmp.lt.s32.totalorder %s342_s22, %s342_s22 }
  0x51   : > { %p2344_p11 = scmp.ne.s32.totalorder %s342_s22, %s2343_s19  ;;  %p2352_p9 = scmp.lt.s32.totalorder %s2343_s19, %s2343_s19 }
  0x53   : > { %p2346_p13 = pnand %p2344_p11, %p2576_p0  ;;  %p2353_p5 = por %p2352_p9, %p2351_p6 }
  0x55   : > { %p2347_p1 = pneg %p2346_p13 }
  0x57   : > { %p2354_p10 = pnand %p2353_p5, %p2347_p1 }
  0x59   : > { %2357 = shalt.err (!%p2354_p10)
}
  0x5a   : > { %s2435_s15 = smov 64   ;;  %s2436_s12 = smov 4  }
  0x5b   : > { %2090 = dma.hbm_to_vmem [thread:$0]  (!%p2560_p12), %s3026_s7, 2048, %s342_s22, [#allocation6], %s2435_s15, %s2435_s15, %s2436_s12  }
  0x5c   : > { %p3053_p2 = scmp.ne.s32.totalorder %s3050_s29, 0 }
  0x5d   : > { %p3054_p3 = scmp.eq.s32.totalorder (!%p3053_p2), %s2522_s21, 0 }
  0x5e   : > { %375 = sbr.rel (%p3053_p2) target bundleno = 1303 (0x517), region = 64 }
  0x65   : > { %2403 = dma.done.wait (%p3054_p3), [#allocation3], 16   ;;  %p3055_p0 = pmov %p3054_p3 }
  0x67   : > { %2405 = vsyncadd (%p3055_p0), [#allocation3], 4294967280  ;;  %p3056_p5 = pmov %p3055_p0 }
  0x68   : > { %p3057_p10 = pmov %p3055_p0 }
  0x69   : > { %2407 = dma.done.wait (%p3056_p5), [#allocation6], 4096  }
  0x6a   : > { %2409 = vsyncadd (%p3057_p10), [#allocation6], 4294963200  ;;  %s1832_s23 = sshll.u32 %s2522_s21, 4  ;;  %v2144_v0 = vld [vmem:[%s3020_s1] sm:$0xff]   ;;  %v2145_v1 = vld [vmem:[%s3020_s1 + $0x8] sm:$0xff]   ;;  %vm478_vm0 = vcmask 261120  }
  0x6b   : > { %p424_p4 = scmp.lt.s32.totalorder %s1832_s23, 31  ;;  %2015 = vmatprep.subr.bf16.mxu0 %v2144_v0  ;;  %v2146_v11 = vld [vmem:[#allocation5 + $0x4] ss:$8 sps:$4 sm:$0xff]   ;;  %v2148_v12 = vld [vmem:[#allocation5] ss:$8 sps:$4 sm:$0xff]   ;;  %v2437_v42 = vmov 0  }
  0x6c   : > { %2016 = vmatpush3.bf16.msra.mxu0 %v2144_v0  ;;  %v2149_v15 = vld [vmem:[#allocation5 + $0x14] ss:$8 sps:$4 sm:$0xff]   ;;  %732 = vmatprep.subr.bf16.mxu1 %v2146_v11  ;;  %v2151_v17 = vld [vmem:[#allocation5 + $0x10] ss:$8 sps:$4 sm:$0xff]   ;;  %v2152_v19 = vld [vmem:[#allocation5 + $0x24] ss:$8 sps:$4 sm:$0xff]  }
  0x6d   : > { %s3070_s23 = smov (!%p424_p4, %s1832_s23), 31  ;;  %2017 = vmatprep.subr.bf16.mxu0 %v2145_v1  ;;  %733 = vmatpush1.bf16.msra.mxu1 %v2148_v12  ;;  %v2154_v21 = vld [vmem:[#allocation5 + $0x20] ss:$8 sps:$4 sm:$0xff]   ;;  %v2155_v23 = vld [vmem:[#allocation5 + $0x34] ss:$8 sps:$4 sm:$0xff]   ;;  %s420_s19 = sand.u32 1, %s2420_s18  }
  0x6e   : > { %s1833_s13 = sshll.u32 %s3070_s23, 3  ;;  %734 = vmatprep.subr.bf16.mxu1 %v2149_v15  ;;  %v2157_v26 = vld [vmem:[#allocation5 + $0x30] ss:$8 sps:$4 sm:$0xff]   ;;  %v2158_v29 = vld [vmem:[#allocation5 + $0x44] ss:$8 sps:$4 sm:$0xff]   ;;  %764 = vmatprep.mubr.bf16.mxu1 %v2437_v42  ;;  %s1831_s15 = sshll.u32 %s420_s19, 7 }
  0x6f   : > { %s2654_s20 = scalar_lea.vmem %s3019_s0, %s1833_s13  ;;  %v2160_v30 = vld [vmem:[#allocation5 + $0x40] ss:$8 sps:$4 sm:$0xff]   ;;  %v2161_v32 = vld [vmem:[#allocation5 + $0x54] ss:$8 sps:$4 sm:$0xff]   ;;  %v2163_v36 = vld [vmem:[#allocation5 + $0x50] ss:$8 sps:$4 sm:$0xff]  }
  0x70   : > { %v431_v2 = vld [vmem:[%s2654_s20] sm:$0xff]  ;;  %v432_v3 = vld [vmem:[%s2654_s20 + $0x8] sm:$0xff]  ;;  %v433_v5 = vld [vmem:[%s2654_s20 + $0x10] sm:$0xff]  ;;  %2018 = vmatpush3.bf16.msra.mxu0 %v2145_v1  ;;  %s2937_s12 = scalar_lea.vmem [#allocation8], %s1831_s15  ;;  %s1924_s17 = sshll.u32 %s2522_s21, 11 }
  0x71   : > { %v447_v4 = vpack.c.bf16 %v432_v3, %v431_v2  ;;  %v434_v6 = vld [vmem:[%s2654_s20 + $0x18] sm:$0xff]  ;;  %v435_v7 = vld [vmem:[%s2654_s20 + $0x20] sm:$0xff]  ;;  %v436_v8 = vld [vmem:[%s2654_s20 + $0x28] sm:$0xff]  ;;  %735 = vmatpush1.bf16.msra.mxu1 %v2151_v17  ;;  %s1728_s11 = sshll.u32 %s2937_s12, 4  ;;  %s3058_s22 = sld [smem:[#allocation18_spill]]  ;;  %s2971_s11 = int_to_ptr.vmem [resolvable:$true] %s1728_s11 }
  0x72   : > { %v448_v9 = vpack.c.bf16 %v434_v6, %v433_v5  ;;  %v449_v10 = vpack.c.bf16 %v436_v8, %v435_v7  ;;  %v437_v13 = vld [vmem:[%s2654_s20 + $0x30] sm:$0xff]  ;;  %v438_v14 = vld [vmem:[%s2654_s20 + $0x38] sm:$0xff]  ;;  %v439_v16 = vld [vmem:[%s2654_s20 + $0x40] sm:$0xff]  ;;  %736 = vmatprep.subr.bf16.mxu1 %v2152_v19  ;;  %s2978_s21 = scalar_lea.sflag [#allocation4], %s420_s19  ;;  %p3059_p7 = scmp.ne.s32.totalorder %s3047_s27, 0 }
  0x73   : > { %2019 = vmatprep.mubr.msk.bf16.mxu0 %vm478_vm0, %v447_v4  ;;  %v440_v18 = vld [vmem:[%s2654_s20 + $0x48] sm:$0xff]  ;;  %v450_v20 = vpack.c.bf16 %v438_v14, %v437_v13  ;;  %v441_v24 = vld [vmem:[%s2654_s20 + $0x50] sm:$0xff]  ;;  %v442_v25 = vld [vmem:[%s2654_s20 + $0x58] sm:$0xff]  ;;  %s2438_s28 = smov [#allocation8]  }
  0x74   : > { %2020 = vmatmul.mubr.msk.bf16.vlgmr.msra.gmra.mrb[0].mxu0 %vm478_vm0, %v448_v9  ;;  %v451_v22 = vpack.c.bf16 %v440_v18, %v439_v16  ;;  %v443_v27 = vld [vmem:[%s2654_s20 + $0x60] sm:$0xff]  ;;  %v444_v28 = vld [vmem:[%s2654_s20 + $0x68] sm:$0xff]  ;;  %v452_v31 = vpack.c.bf16 %v442_v25, %v441_v24  ;;  %v445_v34 = vld [vmem:[%s2654_s20 + $0x70] sm:$0xff]  ;;  %s2362_s26 = sshll.u32 %s2438_s28, 4  ;;  %s2363_s26 = int_to_ptr.vmem [resolvable:$false] %s2362_s26 }
  0x75   : > { %2023 = vmatprep.mubr.msk.bf16.mxu0 %vm478_vm0, %v449_v10  ;;  %737 = vmatpush1.bf16.msra.mxu1 %v2154_v21  ;;  %v453_v33 = vpack.c.bf16 %v444_v28, %v443_v27  ;;  %v446_v35 = vld [vmem:[%s2654_s20 + $0x78] sm:$0xff]  ;;  %v2164_v38 = vld [vmem:[#allocation5 + $0x64] ss:$8 sps:$4 sm:$0xff]   ;;  %v2166_v39 = vld [vmem:[#allocation5 + $0x60] ss:$8 sps:$4 sm:$0xff]   ;;  %s2358_s20 = scalar_lea.vmem %s2971_s11, 2048  ;;  %p2365_p13 = scmp.lt.s32.totalorder %s2971_s11, %s2363_s26 }
  0x76   : > { %738 = vmatprep.subr.bf16.mxu1 %v2155_v23  ;;  %v454_v37 = vpack.c.bf16 %v446_v35, %v445_v34  ;;  %v2167_v40 = vld [vmem:[#allocation5 + $0x74] ss:$8 sps:$4 sm:$0xff]   ;;  %v2169_v41 = vld [vmem:[#allocation5 + $0x70] ss:$8 sps:$4 sm:$0xff]   ;;  %v2172_v44 = vld [vmem:[%s3024_s5 + $0x4] ss:$8 sps:$4 sm:$0xff]   ;;  %p2359_p12 = scmp.ne.s32.totalorder %s2971_s11, %s2358_s20 }
  0x77   : > { %v2170_v43 = vld [vmem:[%s3024_s5] ss:$8 sps:$4 sm:$0xff]   ;;  %v2175_v45 = vld [vmem:[%s3024_s5 + $0x14] ss:$8 sps:$4 sm:$0xff]   ;;  %1097 = vmatprep.subr.bf16.mxu0 %v2172_v44  ;;  %v2173_v46 = vld [vmem:[%s3024_s5 + $0x10] ss:$8 sps:$4 sm:$0xff]   ;;  %s2969_s29 = scalar_lea.hbm %s3058_s22, %s1924_s17 }
  0x78   : > { %1098 = vmatpush1.bf16.msra.mxu0 %v2170_v43  ;;  %v2178_v47 = vld [vmem:[%s3024_s5 + $0x24] ss:$8 sps:$4 sm:$0xff]   ;;  %v2176_v48 = vld [vmem:[%s3024_s5 + $0x20] ss:$8 sps:$4 sm:$0xff]   ;;  %v2181_v49 = vld [vmem:[%s3024_s5 + $0x34] ss:$8 sps:$4 sm:$0xff]   ;;  %p2360_p8 = pnand %p2359_p12, %p3059_p7 }
  0x79   : > { %739 = vmatpush1.bf16.msra.mxu1 %v2157_v26  ;;  %1099 = vmatprep.subr.bf16.mxu0 %v2175_v45  ;;  %v2179_v50 = vld [vmem:[%s3024_s5 + $0x30] ss:$8 sps:$4 sm:$0xff]   ;;  %v2184_v51 = vld [vmem:[%s3024_s5 + $0x44] ss:$8 sps:$4 sm:$0xff]   ;;  %v2182_v52 = vld [vmem:[%s3024_s5 + $0x40] ss:$8 sps:$4 sm:$0xff]  }
  0x7a   : > { %740 = vmatprep.subr.bf16.mxu1 %v2158_v29  ;;  %v2187_v53 = vld [vmem:[%s3024_s5 + $0x54] ss:$8 sps:$4 sm:$0xff]   ;;  %v2185_v54 = vld [vmem:[%s3024_s5 + $0x50] ss:$8 sps:$4 sm:$0xff]   ;;  %v2190_v55 = vld [vmem:[%s3024_s5 + $0x64] ss:$8 sps:$4 sm:$0xff]   ;;  %p2361_p11 = pneg %p2360_p8 }
  0x7b   : > { %v2188_v56 = vld [vmem:[%s3024_s5 + $0x60] ss:$8 sps:$4 sm:$0xff]   ;;  %v2193_v57 = vld [vmem:[%s3024_s5 + $0x74] ss:$8 sps:$4 sm:$0xff]   ;;  %v2191_v58 = vld [vmem:[%s3024_s5 + $0x70] ss:$8 sps:$4 sm:$0xff]  }
  0x7c   : > { %2024 = vmatmul.mubr.msk.bf16.gmra.mrb[4].mxu0 %vm478_vm0, %v450_v20  ;;  %v2196_v59 = vld [vmem:[%s3024_s5 + $0x84] ss:$8 sps:$4 sm:$0xff]   ;;  %v2194_v60 = vld [vmem:[%s3024_s5 + $0x80] ss:$8 sps:$4 sm:$0xff]   ;;  %v2199_v61 = vld [vmem:[%s3024_s5 + $0x94] ss:$8 sps:$4 sm:$0xff]  }
  0x7d   : > { %2027 = vmatprep.mubr.msk.bf16.mxu0 %vm478_vm0, %v451_v22  ;;  %741 = vmatpush1.bf16.msra.mxu1 %v2160_v30  ;;  %v2197_v62 = vld [vmem:[%s3024_s5 + $0x90] ss:$8 sps:$4 sm:$0xff]   ;;  %v2202_v63 = vld [vmem:[%s3024_s5 + $0xa4] ss:$8 sps:$4 sm:$0xff]   ;;  %v2200_v0 = vld [vmem:[%s3024_s5 + $0xa0] ss:$8 sps:$4 sm:$0xff]  }
  0x7e   : > { %742 = vmatprep.subr.bf16.mxu1 %v2161_v32  ;;  %1100 = vmatpush1.bf16.msra.mxu0 %v2173_v46  ;;  %v2205_v1 = vld [vmem:[%s3024_s5 + $0xb4] ss:$8 sps:$4 sm:$0xff]   ;;  %v2203_v2 = vld [vmem:[%s3024_s5 + $0xb0] ss:$8 sps:$4 sm:$0xff]   ;;  %v2208_v3 = vld [vmem:[%s3024_s5 + $0xc4] ss:$8 sps:$4 sm:$0xff]  }
  0x7f   : > { %1101 = vmatprep.subr.bf16.mxu0 %v2178_v47  ;;  %v2206_v4 = vld [vmem:[%s3024_s5 + $0xc0] ss:$8 sps:$4 sm:$0xff]   ;;  %v2211_v5 = vld [vmem:[%s3024_s5 + $0xd4] ss:$8 sps:$4 sm:$0xff]   ;;  %v2209_v6 = vld [vmem:[%s3024_s5 + $0xd0] ss:$8 sps:$4 sm:$0xff]  }
  0x80   : > { %v1834_v7 = vld [vmem:[#allocation2] ss:$0 sm:$0xff]  ;;  %s2364_s24 = scalar_lea.vmem %s2363_s26, 4096 }
  0x81   : > { %743 = vmatpush1.bf16.msra.mxu1 %v2163_v36  ;;  %p2366_p1 = scmp.lt.s32.totalorder %s2364_s24, %s2358_s20 }
  0x82   : > { %744 = vmatprep.subr.bf16.mxu1 %v2164_v38  ;;  %1102 = vmatpush1.bf16.msra.mxu0 %v2176_v48 }
  0x83   : > { %1103 = vmatprep.subr.bf16.mxu0 %v2181_v49  ;;  %p2367_p6 = por %p2366_p1, %p2365_p13 }
  0x84   : > { %2028 = vmatmul.mubr.msk.bf16.gmra.mrb[8].mxu0 %vm478_vm0, %v452_v31 }
  0x85   : > { %2031 = vmatprep.mubr.msk.bf16.mxu0 %vm478_vm0, %v453_v33  ;;  %745 = vmatpush1.bf16.msra.mxu1 %v2166_v39  ;;  %p2368_p9 = pnand %p2367_p6, %p2361_p11 }
  0x86   : > { %746 = vmatprep.subr.bf16.mxu1 %v2167_v40  ;;  %1104 = vmatpush1.bf16.msra.mxu0 %v2179_v50 }
  0x87   : > { %1105 = vmatprep.subr.bf16.mxu0 %v2184_v51 }
  0x89   : > { %747 = vmatpush1.bf16.msra.mxu1 %v2169_v41 }
  0x8a   : > { %1106 = vmatpush1.bf16.msra.mxu0 %v2182_v52 }
  0x8b   : > { %1107 = vmatprep.subr.bf16.mxu0 %v2187_v53 }
  0x8c   : > { %2032 = vmatmul.mubr.msk.bf16.gmra.mrb[12].mxu0 %vm478_vm0, %v454_v37 }
  0x8e   : > { %1108 = vmatpush1.bf16.msra.mxu0 %v2185_v54 }
  0x8f   : > { %1109 = vmatprep.subr.bf16.mxu0 %v2190_v55 }
  0x92   : > { %1110 = vmatpush1.bf16.msra.mxu0 %v2188_v56 }
  0x93   : > { %1111 = vmatprep.subr.bf16.mxu0 %v2193_v57 }
  0x96   : > { %1112 = vmatpush1.bf16.msra.mxu0 %v2191_v58 }
  0x97   : > { %1113 = vmatprep.subr.bf16.mxu0 %v2196_v59 }
  0x9a   : > { %1114 = vmatpush1.bf16.msra.mxu0 %v2194_v60 }
  0x9b   : > { %1115 = vmatprep.subr.bf16.mxu0 %v2199_v61 }
  0x9e   : > { %1116 = vmatpush1.bf16.msra.mxu0 %v2197_v62 }
  0x9f   : > { %1117 = vmatprep.subr.bf16.mxu0 %v2202_v63 }
  0xa2   : > { %1118 = vmatpush1.bf16.msra.mxu0 %v2200_v0 }
  0xa3   : > { %1119 = vmatprep.subr.bf16.mxu0 %v2205_v1  ;;  %v2214_v1 = vld [vmem:[%s3024_s5 + $0xe4] ss:$8 sps:$4 sm:$0xff]  }
  0xa6   : > { %1120 = vmatpush1.bf16.msra.mxu0 %v2203_v2  ;;  %v2212_v2 = vld [vmem:[%s3024_s5 + $0xe0] ss:$8 sps:$4 sm:$0xff]  }
  0xa7   : > { %1121 = vmatprep.subr.bf16.mxu0 %v2208_v3  ;;  %v2217_v3 = vld [vmem:[%s3024_s5 + $0xf4] ss:$8 sps:$4 sm:$0xff]  }
  0xaa   : > { %1122 = vmatpush1.bf16.msra.mxu0 %v2206_v4  ;;  %v2215_v4 = vld [vmem:[%s3024_s5 + $0xf0] ss:$8 sps:$4 sm:$0xff]  }
  0xab   : > { %1123 = vmatprep.subr.bf16.mxu0 %v2211_v5  ;;  %v2219_v5 = vld [vmem:[#allocation7] sm:$0xff]  }
  0xae   : > { %1124 = vmatpush1.bf16.msra.mxu0 %v2209_v6  ;;  %v2220_v6 = vld [vmem:[#allocation7 + $0x48] sm:$0xff]  }
  0xaf   : > { %1125 = vmatprep.subr.bf16.mxu0 %v2214_v1 }
  0xb2   : > { %1126 = vmatpush1.bf16.msra.mxu0 %v2212_v2 }
  0xb3   : > { %1127 = vmatprep.subr.bf16.mxu0 %v2217_v3 }
  0xb6   : > { %1128 = vmatpush1.bf16.msra.mxu0 %v2215_v4 }
 0x147   : > { %v2021_v8 = vpop.f32.mrb[0].mxu0 }
 0x148   : > { %v546_v9 = vadd.f32 %v2021_v8, %v1834_v7  ;;  %v537_v10 = vpop.f32.mrb[1].mxu0  ;;  %v2222_v8 = vld [vmem:[#allocation7 + $0x50] sm:$0xff]  }
 0x149   : > { %v538_v11 = vadd.f32 %v1834_v7, %v537_v10  ;;  %v2022_v12 = vpop.f32.mrb[2].mxu0  ;;  %v2224_v10 = vld [vmem:[#allocation7 + $0x58] sm:$0xff]  }
 0x14a   : > { %v549_v13 = vadd.f32 %v2022_v12, %v1834_v7  ;;  %v540_v14 = vpop.f32.mrb[3].mxu0  ;;  %v602_v16 = vmax.f32 %v546_v9, 0.0  ;;  %v2223_v9 = vld [vmem:[#allocation7 + $0x10] sm:$0xff]   ;;  %v2226_v12 = vld [vmem:[#allocation7 + $0x60] sm:$0xff]  }
 0x14b   : > { %v541_v15 = vadd.f32 %v1834_v7, %v540_v14  ;;  %v600_v18 = vmax.f32 %v538_v11, 0.0  ;;  %v2225_v11 = vld [vmem:[#allocation7 + $0x18] sm:$0xff]   ;;  %v2228_v14 = vld [vmem:[#allocation7 + $0x68] sm:$0xff]  }
 0x14c   : > { %v603_v17 = vmax.f32 %v549_v13, 0.0  ;;  %v2227_v13 = vld [vmem:[#allocation7 + $0x20] sm:$0xff]  }
 0x14d   : > { %v601_v19 = vmax.f32 %v541_v15, 0.0  ;;  %v2229_v15 = vld [vmem:[#allocation7 + $0x28] sm:$0xff]  }
 0x14e   : > { %v617_v20 = vpack.c.bf16 %v603_v17, %v602_v16  ;;  %v2230_v16 = vld [vmem:[#allocation7 + $0x70] sm:$0xff]  }
 0x14f   : > { %v616_v21 = vpack.c.bf16 %v601_v19, %v600_v18  ;;  %v2025_v22 = vpop.f32.mrb[4].mxu0  ;;  %v2231_v17 = vld [vmem:[#allocation7 + $0x30] sm:$0xff]   ;;  %v642_v18 = vlaneseq }
 0x150   : > { %v562_v23 = vadd.f32 %v2025_v22, %v1834_v7  ;;  %v553_v24 = vpop.f32.mrb[5].mxu0 }
 0x151   : > { %765 = vmatmul.mubr.bf16.vlgmr.msra.gmra.mrb[0].mxu1 %v616_v21  ;;  %v554_v25 = vadd.f32 %v1834_v7, %v553_v24  ;;  %v2026_v26 = vpop.f32.mrb[6].mxu0  ;;  %v2790_v19 = vshrl.u32 %v642_v18, 7  ;;  %v640_v21 = vld [vmem:[%s3023_s4] sm:$0x3] }
 0x152   : > { %v606_v27 = vmax.f32 %v562_v23, 0.0  ;;  %v565_v28 = vadd.f32 %v2026_v26, %v1834_v7  ;;  %v556_v29 = vpop.f32.mrb[7].mxu0  ;;  %774 = vmatprep.mubr.bf16.mxu1 %v2437_v42 }
 0x153   : > { %v604_v30 = vmax.f32 %v554_v25, 0.0  ;;  %v557_v31 = vadd.f32 %v1834_v7, %v556_v29  ;;  %v648_v22 = vsub.s32 1, %v2790_v19 }
 0x154   : > { %v607_v32 = vmax.f32 %v565_v28, 0.0 }
 0x155   : > { %v605_v33 = vmax.f32 %v557_v31, 0.0  ;;  %v2803_v24 = vrot.slane %v640_v21, %v648_v22 }
 0x156   : > { %v619_v34 = vpack.c.bf16 %v607_v32, %v606_v27 }
 0x157   : > { %v618_v35 = vpack.c.bf16 %v605_v33, %v604_v30  ;;  %v2029_v36 = vpop.f32.mrb[8].mxu0 }
 0x158   : > { %v578_v37 = vadd.f32 %v2029_v36, %v1834_v7  ;;  %v569_v38 = vpop.f32.mrb[9].mxu0 }
 0x159   : > { %775 = vmatmul.mubr.bf16.gmra.mrb[4].mxu1 %v617_v20  ;;  %v570_v39 = vadd.f32 %v1834_v7, %v569_v38  ;;  %v2030_v40 = vpop.f32.mrb[10].mxu0  ;;  %v644_v20 = vsub.s32 0, %v2790_v19 }
 0x15a   : > { %784 = vmatprep.mubr.bf16.mxu1 %v2437_v42  ;;  %v610_v41 = vmax.f32 %v578_v37, 0.0  ;;  %v581_v43 = vadd.f32 %v2030_v40, %v1834_v7  ;;  %v572_v44 = vpop.f32.mrb[11].mxu0 }
 0x15b   : > { %v608_v45 = vmax.f32 %v570_v39, 0.0  ;;  %v573_v46 = vadd.f32 %v1834_v7, %v572_v44  ;;  %v2799_v23 = vrot.slane %v640_v21, %v644_v20 }
 0x15c   : > { %v611_v47 = vmax.f32 %v581_v43, 0.0 }
 0x15d   : > { %v609_v48 = vmax.f32 %v573_v46, 0.0 }
 0x15e   : > { %v621_v49 = vpack.c.bf16 %v611_v47, %v610_v41 }
 0x15f   : > { %v620_v50 = vpack.c.bf16 %v609_v48, %v608_v45  ;;  %v2033_v51 = vpop.f32.mrb[12].mxu0 }
 0x160   : > { %v594_v52 = vadd.f32 %v2033_v51, %v1834_v7  ;;  %v585_v53 = vpop.f32.mrb[13].mxu0 }
 0x161   : > { %785 = vmatmul.mubr.bf16.gmra.mrb[8].mxu1 %v618_v35  ;;  %v586_v54 = vadd.f32 %v1834_v7, %v585_v53  ;;  %v2034_v55 = vpop.f32.mrb[14].mxu0 }
 0x162   : > { %794 = vmatprep.mubr.bf16.mxu1 %v2437_v42  ;;  %v614_v56 = vmax.f32 %v594_v52, 0.0  ;;  %v597_v57 = vadd.f32 %v2034_v55, %v1834_v7  ;;  %v588_v58 = vpop.f32.mrb[15].mxu0 }
 0x163   : > { %v612_v59 = vmax.f32 %v586_v54, 0.0  ;;  %v589_v60 = vadd.f32 %v1834_v7, %v588_v58  ;;  %v2221_v7 = vld [vmem:[#allocation7 + $0x8] sm:$0xff]  }
 0x164   : > { %v615_v61 = vmax.f32 %v597_v57, 0.0 }
 0x165   : > { %v613_v62 = vmax.f32 %v589_v60, 0.0 }
 0x166   : > { %v623_v63 = vpack.c.bf16 %v615_v61, %v614_v56 }
 0x167   : > { %v622_v0 = vpack.c.bf16 %v613_v62, %v612_v59 }
 0x169   : > { %795 = vmatmul.mubr.bf16.gmra.mrb[12].mxu1 %v619_v34 }
 0x16a   : > { %804 = vmatprep.mubr.bf16.mxu1 %v2437_v42 }
 0x171   : > { %805 = vmatmul.mubr.bf16.gmra.mrb[16].mxu1 %v620_v50 }
 0x172   : > { %814 = vmatprep.mubr.bf16.mxu1 %v2437_v42 }
 0x179   : > { %815 = vmatmul.mubr.bf16.gmra.mrb[20].mxu1 %v621_v49 }
 0x17a   : > { %824 = vmatprep.mubr.bf16.mxu1 %v2437_v42 }
 0x181   : > { %825 = vmatmul.mubr.bf16.gmra.mrb[24].mxu1 %v622_v0 }
 0x182   : > { %834 = vmatprep.mubr.bf16.mxu1 %v2437_v42  ;;  %v2218_v42 = vld [vmem:[#allocation7 + $0x40] sm:$0xff]  }
 0x183   : > { %1935 = vmatprep.subr.bf16.mxu1 %v2218_v42 }
 0x184   : > { %1936 = vmatpush3.bf16.msra.mxu1 %v2219_v5 }
 0x185   : > { %1937 = vmatprep.subr.bf16.mxu1 %v2220_v6 }
 0x188   : > { %1938 = vmatpush3.bf16.msra.mxu1 %v2221_v7 }
 0x189   : > { %835 = vmatmul.mubr.bf16.gmra.mrb[28].mxu1 %v623_v63  ;;  %1939 = vmatprep.subr.bf16.mxu1 %v2222_v8 }
 0x18c   : > { %1940 = vmatpush3.bf16.msra.mxu1 %v2223_v9 }
 0x18d   : > { %1941 = vmatprep.subr.bf16.mxu1 %v2224_v10 }
 0x190   : > { %1942 = vmatpush3.bf16.msra.mxu1 %v2225_v11 }
 0x191   : > { %1943 = vmatprep.subr.bf16.mxu1 %v2226_v12 }
 0x194   : > { %1944 = vmatpush3.bf16.msra.mxu1 %v2227_v13 }
 0x195   : > { %1945 = vmatprep.subr.bf16.mxu1 %v2228_v14 }
 0x198   : > { %1946 = vmatpush3.bf16.msra.mxu1 %v2229_v15 }
 0x199   : > { %1947 = vmatprep.subr.bf16.mxu1 %v2230_v16 }
 0x19c   : > { %1948 = vmatpush3.bf16.msra.mxu1 %v2231_v17 }
 0x224   : > { %v766_v25 = vpop.f32.mrb[0].mxu1 }
 0x225   : > { %v767_v26 = vadd.f32 %v766_v25, %v2799_v23  ;;  %v768_v27 = vpop.f32.mrb[1].mxu1 }
 0x226   : > { %v769_v28 = vadd.f32 %v768_v27, %v2803_v24  ;;  %v770_v29 = vpop.f32.mrb[2].mxu1 }
 0x227   : > { %v771_v30 = vadd.f32 %v770_v29, %v2799_v23  ;;  %v772_v31 = vpop.f32.mrb[3].mxu1  ;;  %v845_v33 = vmax.f32 %v767_v26, 0.0 }
 0x228   : > { %v773_v32 = vadd.f32 %v772_v31, %v2803_v24  ;;  %v846_v35 = vmax.f32 %v769_v28, 0.0 }
 0x229   : > { %v847_v34 = vmax.f32 %v771_v30, 0.0 }
 0x22a   : > { %v848_v36 = vmax.f32 %v773_v32, 0.0 }
 0x22b   : > { %v877_v37 = vpack.c.bf16 %v847_v34, %v845_v33 }
 0x22c   : > { %v878_v38 = vpack.c.bf16 %v848_v36, %v846_v35  ;;  %v776_v39 = vpop.f32.mrb[4].mxu1 }
 0x22d   : > { %v777_v40 = vadd.f32 %v776_v39, %v2799_v23  ;;  %v778_v41 = vpop.f32.mrb[5].mxu1 }
 0x22e   : > { %v779_v43 = vadd.f32 %v778_v41, %v2803_v24  ;;  %v780_v44 = vpop.f32.mrb[6].mxu1  ;;  %1129 = vmatprep.mubr.bf16.mxu0 %v878_v38 }
 0x22f   : > { %v781_v45 = vadd.f32 %v780_v44, %v2799_v23  ;;  %v782_v46 = vpop.f32.mrb[7].mxu1  ;;  %1130 = vmatmul.mubr.bf16.vlgmr.msra.gmra.mrb[16].mxu0 %v877_v37  ;;  %v849_v48 = vmax.f32 %v777_v40, 0.0 }
 0x230   : > { %v783_v47 = vadd.f32 %v782_v46, %v2803_v24  ;;  %v850_v50 = vmax.f32 %v779_v43, 0.0 }
 0x231   : > { %v851_v49 = vmax.f32 %v781_v45, 0.0 }
 0x232   : > { %v852_v51 = vmax.f32 %v783_v47, 0.0 }
 0x233   : > { %v879_v52 = vpack.c.bf16 %v851_v49, %v849_v48 }
 0x234   : > { %v880_v53 = vpack.c.bf16 %v852_v51, %v850_v50  ;;  %v786_v54 = vpop.f32.mrb[8].mxu1 }
 0x235   : > { %v787_v55 = vadd.f32 %v786_v54, %v2799_v23  ;;  %v788_v56 = vpop.f32.mrb[9].mxu1 }
 0x236   : > { %v789_v57 = vadd.f32 %v788_v56, %v2803_v24  ;;  %v790_v58 = vpop.f32.mrb[10].mxu1  ;;  %1139 = vmatprep.mubr.bf16.mxu0 %v880_v53 }
 0x237   : > { %v791_v59 = vadd.f32 %v790_v58, %v2799_v23  ;;  %v792_v60 = vpop.f32.mrb[11].mxu1  ;;  %1140 = vmatmul.mubr.bf16.gmra.mrb[20].mxu0 %v879_v52  ;;  %v853_v62 = vmax.f32 %v787_v55, 0.0 }
 0x238   : > { %v793_v61 = vadd.f32 %v792_v60, %v2803_v24  ;;  %v854_v0 = vmax.f32 %v789_v57, 0.0 }
 0x239   : > { %v855_v63 = vmax.f32 %v791_v59, 0.0 }
 0x23a   : > { %v856_v1 = vmax.f32 %v793_v61, 0.0 }
 0x23b   : > { %v881_v2 = vpack.c.bf16 %v855_v63, %v853_v62 }
 0x23c   : > { %v882_v3 = vpack.c.bf16 %v856_v1, %v854_v0  ;;  %v796_v4 = vpop.f32.mrb[12].mxu1 }
 0x23d   : > { %v797_v42 = vadd.f32 %v796_v4, %v2799_v23  ;;  %v798_v5 = vpop.f32.mrb[13].mxu1 }
 0x23e   : > { %v799_v6 = vadd.f32 %v798_v5, %v2803_v24  ;;  %v800_v7 = vpop.f32.mrb[14].mxu1  ;;  %1149 = vmatprep.mubr.bf16.mxu0 %v882_v3 }
 0x23f   : > { %v801_v8 = vadd.f32 %v800_v7, %v2799_v23  ;;  %v802_v9 = vpop.f32.mrb[15].mxu1  ;;  %1150 = vmatmul.mubr.bf16.gmra.mrb[24].mxu0 %v881_v2  ;;  %v857_v11 = vmax.f32 %v797_v42, 0.0 }
 0x240   : > { %v803_v10 = vadd.f32 %v802_v9, %v2803_v24  ;;  %v858_v13 = vmax.f32 %v799_v6, 0.0 }
 0x241   : > { %v859_v12 = vmax.f32 %v801_v8, 0.0 }
 0x242   : > { %v860_v14 = vmax.f32 %v803_v10, 0.0 }
 0x243   : > { %v883_v15 = vpack.c.bf16 %v859_v12, %v857_v11 }
 0x244   : > { %v884_v16 = vpack.c.bf16 %v860_v14, %v858_v13  ;;  %v806_v17 = vpop.f32.mrb[16].mxu1  ;;  %v2232_v14 = vld [vmem:[#allocation7 + $0x78] sm:$0xff]  }
 0x245   : > { %v807_v18 = vadd.f32 %v806_v17, %v2799_v23  ;;  %v808_v21 = vpop.f32.mrb[17].mxu1  ;;  %1949 = vmatprep.subr.bf16.mxu1 %v2232_v14  ;;  %v925_v17 = vld [vmem:[%s3025_s6] sm:$0x3] }
 0x246   : > { %v809_v25 = vadd.f32 %v808_v21, %v2803_v24  ;;  %v810_v26 = vpop.f32.mrb[18].mxu1  ;;  %1159 = vmatprep.mubr.bf16.mxu0 %v884_v16  ;;  %v2236_v16 = vld [vmem:[%s3028_s9 + $0x10] sm:$0xff]   ;;  %v2855_v21 = vrot.slane %v925_v17, %v648_v22 }
 0x247   : > { %v811_v27 = vadd.f32 %v810_v26, %v2799_v23  ;;  %v812_v28 = vpop.f32.mrb[19].mxu1  ;;  %1160 = vmatmul.mubr.bf16.gmra.mrb[28].mxu0 %v883_v15  ;;  %v861_v30 = vmax.f32 %v807_v18, 0.0  ;;  %v2233_v15 = vld [vmem:[#allocation7 + $0x38] sm:$0xff]   ;;  %v2851_v18 = vrot.slane %v925_v17, %v644_v20 }
 0x248   : > { %v813_v29 = vadd.f32 %v812_v28, %v2803_v24  ;;  %v862_v32 = vmax.f32 %v809_v25, 0.0  ;;  %1950 = vmatpush3.bf16.msra.mxu1 %v2233_v15 }
 0x249   : > { %v863_v31 = vmax.f32 %v811_v27, 0.0 }
 0x24a   : > { %v864_v33 = vmax.f32 %v813_v29, 0.0 }
 0x24b   : > { %v885_v34 = vpack.c.bf16 %v863_v31, %v861_v30 }
 0x24c   : > { %v886_v35 = vpack.c.bf16 %v864_v33, %v862_v32  ;;  %v816_v36 = vpop.f32.mrb[20].mxu1 }
 0x24d   : > { %v817_v37 = vadd.f32 %v816_v36, %v2799_v23  ;;  %v818_v38 = vpop.f32.mrb[21].mxu1 }
 0x24e   : > { %v819_v39 = vadd.f32 %v818_v38, %v2803_v24  ;;  %v820_v40 = vpop.f32.mrb[22].mxu1  ;;  %1169 = vmatprep.mubr.bf16.mxu0 %v886_v35 }
 0x24f   : > { %v821_v41 = vadd.f32 %v820_v40, %v2799_v23  ;;  %v822_v43 = vpop.f32.mrb[23].mxu1  ;;  %1170 = vmatmul.mubr.bf16.gmra.mrb[32].mxu0 %v885_v34  ;;  %v865_v45 = vmax.f32 %v817_v37, 0.0 }
 0x250   : > { %v823_v44 = vadd.f32 %v822_v43, %v2803_v24  ;;  %v866_v47 = vmax.f32 %v819_v39, 0.0 }
 0x251   : > { %v867_v46 = vmax.f32 %v821_v41, 0.0 }
 0x252   : > { %v868_v48 = vmax.f32 %v823_v44, 0.0 }
 0x253   : > { %v887_v49 = vpack.c.bf16 %v867_v46, %v865_v45 }
 0x254   : > { %v888_v50 = vpack.c.bf16 %v868_v48, %v866_v47  ;;  %v826_v51 = vpop.f32.mrb[24].mxu1 }
 0x255   : > { %v827_v52 = vadd.f32 %v826_v51, %v2799_v23  ;;  %v828_v53 = vpop.f32.mrb[25].mxu1 }
 0x256   : > { %v829_v54 = vadd.f32 %v828_v53, %v2803_v24  ;;  %v830_v55 = vpop.f32.mrb[26].mxu1  ;;  %1179 = vmatprep.mubr.bf16.mxu0 %v888_v50 }
 0x257   : > { %v831_v56 = vadd.f32 %v830_v55, %v2799_v23  ;;  %v832_v57 = vpop.f32.mrb[27].mxu1  ;;  %1180 = vmatmul.mubr.bf16.gmra.mrb[36].mxu0 %v887_v49  ;;  %v869_v59 = vmax.f32 %v827_v52, 0.0 }
 0x258   : > { %v833_v58 = vadd.f32 %v832_v57, %v2803_v24  ;;  %v870_v61 = vmax.f32 %v829_v54, 0.0 }
 0x259   : > { %v871_v60 = vmax.f32 %v831_v56, 0.0 }
 0x25a   : > { %v872_v62 = vmax.f32 %v833_v58, 0.0 }
 0x25b   : > { %v889_v63 = vpack.c.bf16 %v871_v60, %v869_v59 }
 0x25c   : > { %v890_v0 = vpack.c.bf16 %v872_v62, %v870_v61  ;;  %v836_v1 = vpop.f32.mrb[28].mxu1 }
 0x25d   : > { %v837_v2 = vadd.f32 %v836_v1, %v2799_v23  ;;  %v838_v3 = vpop.f32.mrb[29].mxu1 }
 0x25e   : > { %v839_v4 = vadd.f32 %v838_v3, %v2803_v24  ;;  %v840_v42 = vpop.f32.mrb[30].mxu1  ;;  %1189 = vmatprep.mubr.bf16.mxu0 %v890_v0 }
 0x25f   : > { %v841_v5 = vadd.f32 %v840_v42, %v2799_v23  ;;  %v842_v6 = vpop.f32.mrb[31].mxu1  ;;  %1190 = vmatmul.mubr.bf16.gmra.mrb[40].mxu0 %v889_v63  ;;  %v873_v8 = vmax.f32 %v837_v2, 0.0  ;;  %v2234_v23 = vld [vmem:[%s3028_s9] sm:$0xff]  }
 0x260   : > { %v843_v7 = vadd.f32 %v842_v6, %v2803_v24  ;;  %v874_v10 = vmax.f32 %v839_v4, 0.0  ;;  %v2235_v24 = vld [vmem:[%s3028_s9 + $0x8] sm:$0xff]   ;;  %2035 = vmatprep.subr.bf16.mxu0 %v2234_v23 }
 0x261   : > { %v875_v9 = vmax.f32 %v841_v5, 0.0  ;;  %2036 = vmatpush3.bf16.msra.mxu0 %v2234_v23 }
 0x262   : > { %v876_v11 = vmax.f32 %v843_v7, 0.0  ;;  %2037 = vmatprep.subr.bf16.mxu0 %v2235_v24 }
 0x263   : > { %v891_v12 = vpack.c.bf16 %v875_v9, %v873_v8 }
 0x264   : > { %v892_v13 = vpack.c.bf16 %v876_v11, %v874_v10 }
 0x265   : > { %2038 = vmatpush3.bf16.msra.mxu0 %v2235_v24 }
 0x266   : > { %1199 = vmatprep.mubr.bf16.mxu0 %v892_v13  ;;  %2039 = vmatprep.subr.bf16.mxu0 %v2236_v16 }
 0x267   : > { %1200 = vmatmul.mubr.bf16.gmra.mrb[44].mxu0 %v891_v12 }
 0x269   : > { %2040 = vmatpush3.bf16.msra.mxu0 %v2236_v16 }
 0x302   : > { %v1131_v25 = vpop.f32.mrb[16].mxu0 }
 0x303   : > { %v1132_v26 = vadd.f32 %v1131_v25, %v2851_v18  ;;  %v1133_v27 = vpop.f32.mrb[17].mxu0 }
 0x304   : > { %v1134_v28 = vadd.f32 %v1133_v27, %v2855_v21  ;;  %v1135_v29 = vpop.f32.mrb[18].mxu0 }
 0x305   : > { %v1136_v30 = vadd.f32 %v1135_v29, %v2851_v18  ;;  %v1137_v31 = vpop.f32.mrb[19].mxu0  ;;  %v1210_v33 = vmax.f32 %v1132_v26, 0.0 }
 0x306   : > { %v1138_v32 = vadd.f32 %v1137_v31, %v2855_v21  ;;  %v1211_v20 = vmax.f32 %v1134_v28, 0.0 }
 0x307   : > { %v1212_v34 = vmax.f32 %v1136_v30, 0.0 }
 0x308   : > { %v1213_v35 = vmax.f32 %v1138_v32, 0.0 }
 0x309   : > { %v1242_v36 = vpack.c.bf16 %v1212_v34, %v1210_v33 }
 0x30a   : > { %v1243_v19 = vpack.c.bf16 %v1213_v35, %v1211_v20  ;;  %v1141_v22 = vpop.f32.mrb[20].mxu0 }
 0x30b   : > { %v1142_v37 = vadd.f32 %v1141_v22, %v2851_v18  ;;  %v1143_v38 = vpop.f32.mrb[21].mxu0 }
 0x30c   : > { %v1144_v39 = vadd.f32 %v1143_v38, %v2855_v21  ;;  %v1145_v40 = vpop.f32.mrb[22].mxu0  ;;  %1425 = vmatprep.mubr.bf16.mxu1 %v1243_v19 }
 0x30d   : > { %v1146_v41 = vadd.f32 %v1145_v40, %v2851_v18  ;;  %v1147_v43 = vpop.f32.mrb[23].mxu0  ;;  %1426 = vmatmul.mubr.bf16.vlgmr.msra.gmra.mrb[32].mxu1 %v1242_v36  ;;  %v1214_v45 = vmax.f32 %v1142_v37, 0.0 }
 0x30e   : > { %v1148_v44 = vadd.f32 %v1147_v43, %v2855_v21  ;;  %v1215_v47 = vmax.f32 %v1144_v39, 0.0 }
 0x30f   : > { %v1216_v46 = vmax.f32 %v1146_v41, 0.0 }
 0x310   : > { %v1217_v48 = vmax.f32 %v1148_v44, 0.0 }
 0x311   : > { %v1244_v49 = vpack.c.bf16 %v1216_v46, %v1214_v45 }
 0x312   : > { %v1245_v50 = vpack.c.bf16 %v1217_v48, %v1215_v47  ;;  %v1151_v51 = vpop.f32.mrb[24].mxu0 }
 0x313   : > { %v1152_v52 = vadd.f32 %v1151_v51, %v2851_v18  ;;  %v1153_v53 = vpop.f32.mrb[25].mxu0 }
 0x314   : > { %v1154_v54 = vadd.f32 %v1153_v53, %v2855_v21  ;;  %v1155_v55 = vpop.f32.mrb[26].mxu0  ;;  %1433 = vmatprep.mubr.bf16.mxu1 %v1245_v50 }
 0x315   : > { %v1156_v56 = vadd.f32 %v1155_v55, %v2851_v18  ;;  %v1157_v57 = vpop.f32.mrb[27].mxu0  ;;  %1434 = vmatmul.mubr.bf16.gmra.mrb[36].mxu1 %v1244_v49  ;;  %v1218_v59 = vmax.f32 %v1152_v52, 0.0 }
 0x316   : > { %v1158_v58 = vadd.f32 %v1157_v57, %v2855_v21  ;;  %v1219_v61 = vmax.f32 %v1154_v54, 0.0 }
 0x317   : > { %v1220_v60 = vmax.f32 %v1156_v56, 0.0 }
 0x318   : > { %v1221_v62 = vmax.f32 %v1158_v58, 0.0 }
 0x319   : > { %v1246_v63 = vpack.c.bf16 %v1220_v60, %v1218_v59 }
 0x31a   : > { %v1247_v0 = vpack.c.bf16 %v1221_v62, %v1219_v61  ;;  %v1161_v1 = vpop.f32.mrb[28].mxu0 }
 0x31b   : > { %v1162_v2 = vadd.f32 %v1161_v1, %v2851_v18  ;;  %v1163_v3 = vpop.f32.mrb[29].mxu0 }
 0x31c   : > { %v1164_v4 = vadd.f32 %v1163_v3, %v2855_v21  ;;  %v1165_v42 = vpop.f32.mrb[30].mxu0  ;;  %1441 = vmatprep.mubr.bf16.mxu1 %v1247_v0 }
 0x31d   : > { %v1166_v5 = vadd.f32 %v1165_v42, %v2851_v18  ;;  %v1167_v6 = vpop.f32.mrb[31].mxu0  ;;  %1442 = vmatmul.mubr.bf16.gmra.mrb[40].mxu1 %v1246_v63  ;;  %v1222_v8 = vmax.f32 %v1162_v2, 0.0 }
 0x31e   : > { %v1168_v7 = vadd.f32 %v1167_v6, %v2855_v21  ;;  %v1223_v10 = vmax.f32 %v1164_v4, 0.0 }
 0x31f   : > { %v1224_v9 = vmax.f32 %v1166_v5, 0.0 }
 0x320   : > { %v1225_v11 = vmax.f32 %v1168_v7, 0.0 }
 0x321   : > { %v1248_v12 = vpack.c.bf16 %v1224_v9, %v1222_v8  ;;  %v2237_v8 = vld [vmem:[%s3028_s9 + $0x18] sm:$0xff]   ;;  %v2240_v9 = vld [vmem:[%s3028_s9 + $0x30] sm:$0xff]  }
 0x322   : > { %v1249_v13 = vpack.c.bf16 %v1225_v11, %v1223_v10  ;;  %v1171_v14 = vpop.f32.mrb[32].mxu0  ;;  %2041 = vmatprep.subr.bf16.mxu0 %v2237_v8  ;;  %v2241_v10 = vld [vmem:[%s3028_s9 + $0x38] sm:$0xff]  }
 0x323   : > { %v1172_v15 = vadd.f32 %v1171_v14, %v2851_v18  ;;  %v1173_v23 = vpop.f32.mrb[33].mxu0  ;;  %2042 = vmatpush3.bf16.msra.mxu0 %v2237_v8 }
 0x324   : > { %v1174_v24 = vadd.f32 %v1173_v23, %v2855_v21  ;;  %v1175_v16 = vpop.f32.mrb[34].mxu0  ;;  %1449 = vmatprep.mubr.bf16.mxu1 %v1249_v13 }
 0x325   : > { %v1176_v17 = vadd.f32 %v1175_v16, %v2851_v18  ;;  %v1177_v25 = vpop.f32.mrb[35].mxu0  ;;  %1450 = vmatmul.mubr.bf16.gmra.mrb[44].mxu1 %v1248_v12  ;;  %v1226_v27 = vmax.f32 %v1172_v15, 0.0  ;;  %v2907_v12 = vld [vmem:[%s3027_s8] ss:$0 sm:$0xff] }
 0x326   : > { %v1178_v26 = vadd.f32 %v1177_v25, %v2855_v21  ;;  %v1227_v29 = vmax.f32 %v1174_v24, 0.0 }
 0x327   : > { %v1228_v28 = vmax.f32 %v1176_v17, 0.0 }
 0x328   : > { %v1229_v30 = vmax.f32 %v1178_v26, 0.0 }
 0x329   : > { %v1250_v31 = vpack.c.bf16 %v1228_v28, %v1226_v27 }
 0x32a   : > { %v1251_v32 = vpack.c.bf16 %v1229_v30, %v1227_v29  ;;  %v1181_v33 = vpop.f32.mrb[36].mxu0 }
 0x32b   : > { %v1182_v34 = vadd.f32 %v1181_v33, %v2851_v18  ;;  %v1183_v20 = vpop.f32.mrb[37].mxu0 }
 0x32c   : > { %v1184_v35 = vadd.f32 %v1183_v20, %v2855_v21  ;;  %v1185_v36 = vpop.f32.mrb[38].mxu0  ;;  %1457 = vmatprep.mubr.bf16.mxu1 %v1251_v32 }
 0x32d   : > { %v1186_v19 = vadd.f32 %v1185_v36, %v2851_v18  ;;  %v1187_v22 = vpop.f32.mrb[39].mxu0  ;;  %1458 = vmatmul.mubr.bf16.gmra.mrb[48].mxu1 %v1250_v31  ;;  %v1230_v38 = vmax.f32 %v1182_v34, 0.0 }
 0x32e   : > { %v1188_v37 = vadd.f32 %v1187_v22, %v2855_v21  ;;  %v1231_v40 = vmax.f32 %v1184_v35, 0.0 }
 0x32f   : > { %v1232_v39 = vmax.f32 %v1186_v19, 0.0 }
 0x330   : > { %v1233_v41 = vmax.f32 %v1188_v37, 0.0 }
 0x331   : > { %v1252_v43 = vpack.c.bf16 %v1232_v39, %v1230_v38 }
 0x332   : > { %v1253_v44 = vpack.c.bf16 %v1233_v41, %v1231_v40  ;;  %v1191_v45 = vpop.f32.mrb[40].mxu0 }
 0x333   : > { %v1192_v46 = vadd.f32 %v1191_v45, %v2851_v18  ;;  %v1193_v47 = vpop.f32.mrb[41].mxu0 }
 0x334   : > { %v1194_v48 = vadd.f32 %v1193_v47, %v2855_v21  ;;  %v1195_v49 = vpop.f32.mrb[42].mxu0  ;;  %1465 = vmatprep.mubr.bf16.mxu1 %v1253_v44 }
 0x335   : > { %v1196_v50 = vadd.f32 %v1195_v49, %v2851_v18  ;;  %v1197_v51 = vpop.f32.mrb[43].mxu0  ;;  %1466 = vmatmul.mubr.bf16.gmra.mrb[52].mxu1 %v1252_v43  ;;  %v1234_v53 = vmax.f32 %v1192_v46, 0.0 }
 0x336   : > { %v1198_v52 = vadd.f32 %v1197_v51, %v2855_v21  ;;  %v1235_v55 = vmax.f32 %v1194_v48, 0.0 }
 0x337   : > { %v1236_v54 = vmax.f32 %v1196_v50, 0.0 }
 0x338   : > { %v1237_v56 = vmax.f32 %v1198_v52, 0.0 }
 0x339   : > { %v1254_v57 = vpack.c.bf16 %v1236_v54, %v1234_v53 }
 0x33a   : > { %v1255_v58 = vpack.c.bf16 %v1237_v56, %v1235_v55  ;;  %v1201_v59 = vpop.f32.mrb[44].mxu0 }
 0x33b   : > { %v1202_v60 = vadd.f32 %v1201_v59, %v2851_v18  ;;  %v1203_v61 = vpop.f32.mrb[45].mxu0 }
 0x33c   : > { %v1204_v62 = vadd.f32 %v1203_v61, %v2855_v21  ;;  %v1205_v63 = vpop.f32.mrb[46].mxu0  ;;  %1473 = vmatprep.mubr.bf16.mxu1 %v1255_v58 }
 0x33d   : > { %v1206_v0 = vadd.f32 %v1205_v63, %v2851_v18  ;;  %v1207_v1 = vpop.f32.mrb[47].mxu0  ;;  %1474 = vmatmul.mubr.bf16.gmra.mrb[56].mxu1 %v1254_v57  ;;  %v1238_v3 = vmax.f32 %v1202_v60, 0.0  ;;  %v2238_v18 = vld [vmem:[%s3028_s9 + $0x20] sm:$0xff]  }
 0x33e   : > { %v1208_v2 = vadd.f32 %v1207_v1, %v2855_v21  ;;  %v1239_v42 = vmax.f32 %v1204_v62, 0.0  ;;  %2043 = vmatprep.subr.bf16.mxu0 %v2238_v18  ;;  %v2239_v21 = vld [vmem:[%s3028_s9 + $0x28] sm:$0xff]  }
 0x33f   : > { %v1240_v4 = vmax.f32 %v1206_v0, 0.0  ;;  %2044 = vmatpush3.bf16.msra.mxu0 %v2238_v18 }
 0x340   : > { %v1241_v5 = vmax.f32 %v1208_v2, 0.0  ;;  %2045 = vmatprep.subr.bf16.mxu0 %v2239_v21 }
 0x341   : > { %v1256_v6 = vpack.c.bf16 %v1240_v4, %v1238_v3 }
 0x342   : > { %v1257_v7 = vpack.c.bf16 %v1241_v5, %v1239_v42 }
 0x343   : > { %2046 = vmatpush3.bf16.msra.mxu0 %v2239_v21 }
 0x344   : > { %1481 = vmatprep.mubr.bf16.mxu1 %v1257_v7  ;;  %2047 = vmatprep.subr.bf16.mxu0 %v2240_v9 }
 0x345   : > { %1482 = vmatmul.mubr.bf16.gmra.mrb[60].mxu1 %v1256_v6 }
 0x347   : > { %2048 = vmatpush3.bf16.msra.mxu0 %v2240_v9 }
 0x348   : > { %2049 = vmatprep.subr.bf16.mxu0 %v2241_v10 }
 0x34b   : > { %2050 = vmatpush3.bf16.msra.mxu0 %v2241_v10 }
 0x3e0   : > { %v1951_v11 = vpop.f32.mrb[32].mxu1 }
 0x3e1   : > { %v1952_v13 = vpop.f32.mrb[33].mxu1 }
 0x3e2   : > { %v1953_v14 = vadd.f32 %v1952_v13, %v1951_v11  ;;  %v1954_v15 = vpop.f32.mrb[34].mxu1 }
 0x3e3   : > { %v1955_v23 = vpop.f32.mrb[35].mxu1 }
 0x3e4   : > { %v1428_v24 = vadd.f32 %v1953_v14, %v2907_v12  ;;  %v1956_v16 = vadd.f32 %v1955_v23, %v1954_v15 }
 0x3e6   : > { %v1431_v17 = vadd.f32 %v1956_v16, %v2907_v12  ;;  %v1490_v25 = vmax.f32 %v1428_v24, 0.0 }
 0x3e8   : > { %v1491_v26 = vmax.f32 %v1431_v17, 0.0  ;;  %v1957_v27 = vpop.f32.mrb[36].mxu1 }
 0x3e9   : > { %v1958_v28 = vpop.f32.mrb[37].mxu1 }
 0x3ea   : > { %v1959_v29 = vadd.f32 %v1958_v28, %v1957_v27  ;;  %v1960_v30 = vpop.f32.mrb[38].mxu1  ;;  %v1506_v31 = vpack.c.bf16 %v1491_v26, %v1490_v25 }
 0x3eb   : > { %v1961_v32 = vpop.f32.mrb[39].mxu1 }
 0x3ec   : > { %v1436_v33 = vadd.f32 %v1959_v29, %v2907_v12  ;;  %v1962_v34 = vadd.f32 %v1961_v32, %v1960_v30  ;;  %2051 = vmatprep.mubr.bf16.mxu0 %v1506_v31 }
 0x3ee   : > { %v1439_v20 = vadd.f32 %v1962_v34, %v2907_v12  ;;  %v1492_v35 = vmax.f32 %v1436_v33, 0.0 }
 0x3f0   : > { %v1493_v36 = vmax.f32 %v1439_v20, 0.0  ;;  %v1963_v19 = vpop.f32.mrb[40].mxu1 }
 0x3f1   : > { %v1964_v22 = vpop.f32.mrb[41].mxu1 }
 0x3f2   : > { %v1507_v37 = vpack.c.bf16 %v1493_v36, %v1492_v35  ;;  %v1965_v38 = vadd.f32 %v1964_v22, %v1963_v19  ;;  %v1966_v39 = vpop.f32.mrb[42].mxu1 }
 0x3f3   : > { %v1967_v40 = vpop.f32.mrb[43].mxu1 }
 0x3f4   : > { %v1444_v41 = vadd.f32 %v1965_v38, %v2907_v12  ;;  %v1968_v43 = vadd.f32 %v1967_v40, %v1966_v39  ;;  %2052 = vmatmul.mubr.bf16.vlgmr.msra.gmra.mrb[48].mxu0 %v1507_v37  ;;  %v2928_v39 = vld [vmem:[%s3029_s10] ss:$0 sm:$0xff] }
 0x3f6   : > { %v1447_v44 = vadd.f32 %v1968_v43, %v2907_v12  ;;  %v1494_v45 = vmax.f32 %v1444_v41, 0.0 }
 0x3f8   : > { %v1495_v46 = vmax.f32 %v1447_v44, 0.0  ;;  %v1969_v47 = vpop.f32.mrb[44].mxu1 }
 0x3f9   : > { %v1970_v48 = vpop.f32.mrb[45].mxu1 }
 0x3fa   : > { %v1971_v49 = vadd.f32 %v1970_v48, %v1969_v47  ;;  %v1972_v50 = vpop.f32.mrb[46].mxu1  ;;  %v1508_v51 = vpack.c.bf16 %v1495_v46, %v1494_v45 }
 0x3fb   : > { %v1973_v52 = vpop.f32.mrb[47].mxu1 }
 0x3fc   : > { %v1452_v53 = vadd.f32 %v1971_v49, %v2907_v12  ;;  %v1974_v54 = vadd.f32 %v1973_v52, %v1972_v50  ;;  %2055 = vmatprep.mubr.bf16.mxu0 %v1508_v51 }
 0x3fe   : > { %v1455_v55 = vadd.f32 %v1974_v54, %v2907_v12  ;;  %v1496_v56 = vmax.f32 %v1452_v53, 0.0 }
 0x400   : > { %v1497_v57 = vmax.f32 %v1455_v55, 0.0  ;;  %v1975_v58 = vpop.f32.mrb[48].mxu1 }
 0x401   : > { %v1976_v59 = vpop.f32.mrb[49].mxu1 }
 0x402   : > { %v1977_v60 = vadd.f32 %v1976_v59, %v1975_v58  ;;  %v1978_v61 = vpop.f32.mrb[50].mxu1  ;;  %v1509_v62 = vpack.c.bf16 %v1497_v57, %v1496_v56 }
 0x403   : > { %v1979_v63 = vpop.f32.mrb[51].mxu1 }
 0x404   : > { %v1460_v0 = vadd.f32 %v1977_v60, %v2907_v12  ;;  %v1980_v1 = vadd.f32 %v1979_v63, %v1978_v61  ;;  %2056 = vmatmul.mubr.bf16.gmra.mrb[52].mxu0 %v1509_v62 }
 0x406   : > { %v1463_v2 = vadd.f32 %v1980_v1, %v2907_v12  ;;  %v1498_v3 = vmax.f32 %v1460_v0, 0.0 }
 0x408   : > { %v1499_v4 = vmax.f32 %v1463_v2, 0.0  ;;  %v1981_v42 = vpop.f32.mrb[52].mxu1 }
 0x409   : > { %v1982_v5 = vpop.f32.mrb[53].mxu1 }
 0x40a   : > { %v1983_v6 = vadd.f32 %v1982_v5, %v1981_v42  ;;  %v1984_v7 = vpop.f32.mrb[54].mxu1  ;;  %v1510_v8 = vpack.c.bf16 %v1499_v4, %v1498_v3 }
 0x40b   : > { %v1985_v18 = vpop.f32.mrb[55].mxu1 }
 0x40c   : > { %v1468_v21 = vadd.f32 %v1983_v6, %v2907_v12  ;;  %v1986_v9 = vadd.f32 %v1985_v18, %v1984_v7  ;;  %2059 = vmatprep.mubr.bf16.mxu0 %v1510_v8 }
 0x40e   : > { %v1471_v10 = vadd.f32 %v1986_v9, %v2907_v12  ;;  %v1500_v11 = vmax.f32 %v1468_v21, 0.0 }
 0x410   : > { %v1501_v13 = vmax.f32 %v1471_v10, 0.0  ;;  %v1987_v14 = vpop.f32.mrb[56].mxu1 }
 0x411   : > { %v1988_v15 = vpop.f32.mrb[57].mxu1 }
 0x412   : > { %v1989_v23 = vadd.f32 %v1988_v15, %v1987_v14  ;;  %v1990_v24 = vpop.f32.mrb[58].mxu1  ;;  %v1511_v16 = vpack.c.bf16 %v1501_v13, %v1500_v11 }
 0x413   : > { %v1991_v17 = vpop.f32.mrb[59].mxu1 }
 0x414   : > { %v1476_v25 = vadd.f32 %v1989_v23, %v2907_v12  ;;  %v1992_v26 = vadd.f32 %v1991_v17, %v1990_v24  ;;  %2060 = vmatmul.mubr.bf16.gmra.mrb[56].mxu0 %v1511_v16 }
 0x416   : > { %v1479_v27 = vadd.f32 %v1992_v26, %v2907_v12  ;;  %v1502_v28 = vmax.f32 %v1476_v25, 0.0 }
 0x418   : > { %v1503_v29 = vmax.f32 %v1479_v27, 0.0  ;;  %v1993_v30 = vpop.f32.mrb[60].mxu1 }
 0x419   : > { %v1994_v31 = vpop.f32.mrb[61].mxu1 }
 0x41a   : > { %v1995_v32 = vadd.f32 %v1994_v31, %v1993_v30  ;;  %v1996_v33 = vpop.f32.mrb[62].mxu1  ;;  %v1512_v34 = vpack.c.bf16 %v1503_v29, %v1502_v28 }
 0x41b   : > { %v1997_v20 = vpop.f32.mrb[63].mxu1 }
 0x41c   : > { %v1484_v35 = vadd.f32 %v1995_v32, %v2907_v12  ;;  %v1998_v36 = vadd.f32 %v1997_v20, %v1996_v33  ;;  %2063 = vmatprep.mubr.bf16.mxu0 %v1512_v34 }
 0x41e   : > { %v1487_v19 = vadd.f32 %v1998_v36, %v2907_v12  ;;  %v1504_v22 = vmax.f32 %v1484_v35, 0.0 }
 0x420   : > { %v1505_v37 = vmax.f32 %v1487_v19, 0.0 }
 0x422   : > { %v1513_v38 = vpack.c.bf16 %v1505_v37, %v1504_v22 }
 0x424   : > { %2064 = vmatmul.mubr.bf16.gmra.mrb[60].mxu0 %v1513_v38 }
 0x4c7   : > { %v2053_v40 = vpop.f32.mrb[48].mxu0 }
 0x4c8   : > { %v1628_v41 = vadd.f32 %v2053_v40, %v2928_v39  ;;  %v1619_v43 = vpop.f32.mrb[49].mxu0 }
 0x4c9   : > { %v1620_v44 = vadd.f32 %v2928_v39, %v1619_v43  ;;  %v2054_v45 = vpop.f32.mrb[50].mxu0 }
 0x4ca   : > { %2242 = vtanh.f32 %v1628_v41  ;;  %v1631_v12 = vadd.f32 %v2054_v45, %v2928_v39  ;;  %v1622_v46 = vpop.f32.mrb[51].mxu0 }
 0x4cb   : > { %2244 = vtanh.f32 %v1620_v44  ;;  %v1623_v47 = vadd.f32 %v2928_v39, %v1622_v46 }
 0x4cc   : > { %2246 = vtanh.f32 %v1631_v12 }
 0x4cd   : > { %2248 = vtanh.f32 %v1623_v47 }
 0x4d4   : > { %v2243_v48 = vpop.eup %2242 }
 0x4d5   : > { %v2245_v49 = vpop.eup %2244  ;;  %1700 = vst [vmem:[%s2937_s12 + $0x10] sm:$0xff] %v2243_v48 }
 0x4d6   : > { %v2247_v50 = vpop.eup %2246  ;;  %1698 = vst [vmem:[%s2937_s12] sm:$0xff] %v2245_v49 }
 0x4d7   : > { %v2249_v51 = vpop.eup %2248  ;;  %1701 = vst [vmem:[%s2937_s12 + $0x18] sm:$0xff] %v2247_v50  ;;  %v2057_v52 = vpop.f32.mrb[52].mxu0 }
 0x4d8   : > { %1699 = vst [vmem:[%s2937_s12 + $0x8] sm:$0xff] %v2249_v51  ;;  %v1644_v53 = vadd.f32 %v2057_v52, %v2928_v39  ;;  %v1635_v54 = vpop.f32.mrb[53].mxu0 }
 0x4d9   : > { %v1636_v55 = vadd.f32 %v2928_v39, %v1635_v54  ;;  %v2058_v56 = vpop.f32.mrb[54].mxu0 }
 0x4da   : > { %2250 = vtanh.f32 %v1644_v53  ;;  %v1647_v57 = vadd.f32 %v2058_v56, %v2928_v39  ;;  %v1638_v58 = vpop.f32.mrb[55].mxu0 }
 0x4db   : > { %2252 = vtanh.f32 %v1636_v55  ;;  %v1639_v59 = vadd.f32 %v2928_v39, %v1638_v58 }
 0x4dc   : > { %2254 = vtanh.f32 %v1647_v57 }
 0x4dd   : > { %2256 = vtanh.f32 %v1639_v59 }
 0x4e4   : > { %v2251_v60 = vpop.eup %2250 }
 0x4e5   : > { %v2253_v61 = vpop.eup %2252  ;;  %1704 = vst [vmem:[%s2937_s12 + $0x30] sm:$0xff] %v2251_v60 }
 0x4e6   : > { %v2255_v62 = vpop.eup %2254  ;;  %1702 = vst [vmem:[%s2937_s12 + $0x20] sm:$0xff] %v2253_v61 }
 0x4e7   : > { %v2257_v63 = vpop.eup %2256  ;;  %1705 = vst [vmem:[%s2937_s12 + $0x38] sm:$0xff] %v2255_v62  ;;  %v2061_v0 = vpop.f32.mrb[56].mxu0 }
 0x4e8   : > { %1703 = vst [vmem:[%s2937_s12 + $0x28] sm:$0xff] %v2257_v63  ;;  %v1660_v1 = vadd.f32 %v2061_v0, %v2928_v39  ;;  %v1651_v2 = vpop.f32.mrb[57].mxu0 }
 0x4e9   : > { %v1652_v3 = vadd.f32 %v2928_v39, %v1651_v2  ;;  %v2062_v4 = vpop.f32.mrb[58].mxu0 }
 0x4ea   : > { %2258 = vtanh.f32 %v1660_v1  ;;  %v1663_v42 = vadd.f32 %v2062_v4, %v2928_v39  ;;  %v1654_v5 = vpop.f32.mrb[59].mxu0 }
 0x4eb   : > { %2260 = vtanh.f32 %v1652_v3  ;;  %v1655_v6 = vadd.f32 %v2928_v39, %v1654_v5 }
 0x4ec   : > { %2262 = vtanh.f32 %v1663_v42 }
 0x4ed   : > { %2264 = vtanh.f32 %v1655_v6 }
 0x4f4   : > { %v2259_v7 = vpop.eup %2258 }
 0x4f5   : > { %v2261_v8 = vpop.eup %2260  ;;  %1708 = vst [vmem:[%s2937_s12 + $0x50] sm:$0xff] %v2259_v7 }
 0x4f6   : > { %v2263_v18 = vpop.eup %2262  ;;  %1706 = vst [vmem:[%s2937_s12 + $0x40] sm:$0xff] %v2261_v8 }
 0x4f7   : > { %v2265_v21 = vpop.eup %2264  ;;  %1709 = vst [vmem:[%s2937_s12 + $0x58] sm:$0xff] %v2263_v18  ;;  %v2065_v9 = vpop.f32.mrb[60].mxu0 }
 0x4f8   : > { %1707 = vst [vmem:[%s2937_s12 + $0x48] sm:$0xff] %v2265_v21  ;;  %v1676_v10 = vadd.f32 %v2065_v9, %v2928_v39  ;;  %v1667_v11 = vpop.f32.mrb[61].mxu0 }
 0x4f9   : > { %v1668_v13 = vadd.f32 %v2928_v39, %v1667_v11  ;;  %v2066_v14 = vpop.f32.mrb[62].mxu0 }
 0x4fa   : > { %2266 = vtanh.f32 %v1676_v10  ;;  %v1679_v15 = vadd.f32 %v2066_v14, %v2928_v39  ;;  %v1670_v23 = vpop.f32.mrb[63].mxu0 }
 0x4fb   : > { %2268 = vtanh.f32 %v1668_v13  ;;  %v1671_v24 = vadd.f32 %v2928_v39, %v1670_v23 }
 0x4fc   : > { %2270 = vtanh.f32 %v1679_v15 }
 0x4fd   : > { %2272 = vtanh.f32 %v1671_v24 }
 0x504   : > { %v2267_v16 = vpop.eup %2266 }
 0x505   : > { %v2269_v17 = vpop.eup %2268  ;;  %1712 = vst [vmem:[%s2937_s12 + $0x70] sm:$0xff] %v2267_v16 }
 0x506   : > { %v2271_v25 = vpop.eup %2270  ;;  %1710 = vst [vmem:[%s2937_s12 + $0x60] sm:$0xff] %v2269_v17 }
 0x507   : > { %v2273_v26 = vpop.eup %2272  ;;  %1713 = vst [vmem:[%s2937_s12 + $0x78] sm:$0xff] %v2271_v25 }
 0x508   : > { %1711 = vst [vmem:[%s2937_s12 + $0x68] sm:$0xff] %v2273_v26 }
 0x509   : > { %2371 = shalt.err (!%p2368_p9)
}
 0x50a   : > { %s2372_s25 = scalar_lea.hbm %s2969_s29, 2048  ;;  %s2376_s16 = scalar_lea.hbm %s3058_s22, 4096 }
 0x50b   : > { %p2373_p2 = scmp.ne.s32.totalorder %s2969_s29, %s2372_s25  ;;  %p2377_p5 = scmp.lt.u32.totalorder %s2969_s29, %s3058_s22 }
 0x50c   : > { %p2378_p10 = scmp.lt.u32.totalorder %s2376_s16, %s2372_s25  ;;  %p2380_p12 = scmp.lt.u32.totalorder %s2372_s25, %s2969_s29 }
 0x50d   : > { %p2374_p3 = pnand %p2373_p2, %p3059_p7 }
 0x50e   : > { %p2379_p4 = por %p2378_p10, %p2377_p5 }
 0x50f   : > { %p2375_p0 = pneg %p2374_p3 }
 0x510   : > { %p2381_p8 = por %p2380_p12, %p2379_p4 }
 0x512   : > { %p2382_p11 = pnand %p2381_p8, %p2375_p0 }
 0x514   : > { %2385 = shalt.err (!%p2382_p11)
}
 0x515   : > { %s2439_s12 = smov 128   ;;  %s2440_s17 = smov 8  }
 0x516   : > { %2079 = dma.vmem_to_hbm [thread:$0]  (%p3059_p7), %s2971_s11, 2048, %s2969_s29, %s2978_s21, %s2439_s12, %s2439_s12, %s2440_s17  }
 0x517 PF: > { %s3060_s23 = sld [smem:[#allocation14_spill]]  ;;  %s3061_s13 = sld [smem:[#allocation12_spill]] }
 0x518   : > { %s3062_s20 = sld [smem:[#allocation17_spill]] }
 0x51d   : > { %p2101_p13 = scmp.ge.s32.totalorder %s3060_s23, 2  ;;  %s1743_s28 = sand.u32 1, %s3061_s13  }
 0x51e   : > { %p3063_p1 = scmp.ne.s32.totalorder %s3062_s20, 0  ;;  %s1744_s26 = scalar_lea.sflag [#allocation4], %s1743_s28 }
 0x520   : > { %p2092_p6 = pnand %p2101_p13, %p3063_p1 }
 0x522   : > { %2411 = dma.done.wait (!%p2092_p6), %s1744_s26, 2048  }
 0x523   : > { %2413 = vsyncadd (!%p2092_p6), %s1744_s26, 4294965248  ;;  %s3064_s20 = sld [smem:[#allocation15_spill]]  ;;  %s3065_s24 = sld [smem:[#allocation13_spill]] }
 0x524   : > { %s3066_s19 = sld [smem:[#allocation16_spill]]  ;;  %s3067_s17 = smov %s2420_s18 }
 0x529   : > { %p23_p9 = scmp.ge.s32.totalorder %s3064_s20, 4   ;;  %s3068_s18 = smov %s3065_s24 }
 0x52b   :  { %25 = sbr.rel (!%p23_p9) target bundleno = 7 (0x7), region = 112 }
 0x532   :  { %1749 = vsyncpa [#allocation3], 1 }
 0x533   :  { %1751 = vsyncpa [#allocation3 + $0x1], 1 }
 0x534   :  { %1752 = vsyncpa [#allocation6], 1 }
 0x535   :  { %1753 = vsyncpa [#allocation4], 1 }
 0x536   :  { %1755 = vsyncpa [#allocation4 + $0x1], 1 }

</bundles_post_ra>
